<compile_context>
chip_gen: v7x
topology: tpu7x:2x2x1
jax: 0.10.0
libtpu: 0.0.40
codegen_flags: <defaults>
</compile_context>

<pallas_src>
import functools

import jax
import jax.numpy as jnp
from jax.experimental import pallas as pl
from jax.experimental.pallas import tpu as pltpu


def _round_up(x, m):
    return (x + m - 1) // m * m


# -----------------------------------------------------------------------------
# Fused Pallas kernel: one batch element, all layers, everything on-chip.
# -----------------------------------------------------------------------------
def _fused_predictor_kernel(*refs, k, wp, npads):
    """refs = (x, [w_i, b_i, m_i] * S, pred_w, pred_b, out)

    x_ref   : (1, Cin0, L)        channels on sublanes, flattened spatial on lanes
    w_i     : (k*k, Cout, Cin_i)  tap-major conv filters
    b_i     : (Cout, 1)           bias (broadcast over lanes)
    m_i     : (1, npads[i])       mask weight, zeros in wrap/junk/tail lanes
    pred_w  : (1, hidden)         1x1 conv weight
    pred_b  : (1, 1)
    out_ref : (1, 1, npads[-1])   lane-dense prediction row
    """
    n_layers = len(npads)
    x_ref = refs[0]
    pw_ref = refs[1 + 3 * n_layers]
    pb_ref = refs[2 + 3 * n_layers]
    o_ref = refs[-1]

    h = x_ref[0]                                     # (Cin0, L) f32
    for i in range(n_layers):
        w_ref = refs[1 + 3 * i]                      # (k*k, Cout, Cin)
        b_ref = refs[2 + 3 * i]                      # (Cout, 1)
        m_ref = refs[3 + 3 * i]                      # (1, npads[i])
        n_out = npads[i]
        cout = w_ref.shape[1]
        acc = jnp.zeros((cout, n_out), jnp.float32)
        for t in range(k * k):                       # static unroll over taps
            s = (t // k) * wp + (t % k)              # tap offset in flat layout
            acc += jnp.dot(w_ref[t], h[:, s:s + n_out],
                           preferred_element_type=jnp.float32)
        # conv + bias -> relu -> * mask-weight  (mask zeros the wrap columns)
        h = jnp.maximum(acc + b_ref[...], 0.0) * m_ref[...]

    # 1x1 pred conv as a lane-dense (1, C) x (C, N) matmul epilogue.
    y = jnp.dot(pw_ref[...], h, preferred_element_type=jnp.float32) + pb_ref[...]
    o_ref[0] = y


# -----------------------------------------------------------------------------
# Wrapper: geometry, flattening, BlockSpecs.  Only the tiny original input is
# padded host/XLA-side; everything downstream happens inside one pallas_call.
# -----------------------------------------------------------------------------
def predictor_forward(x_nchw, conv_w_taps, conv_b, masks, pred_w, pred_b, *,
                      k, padding):
    B, cin0, H, W = x_nchw.shape
    S = len(conv_w_taps)
    Hp, Wp = H + 2 * padding, W + 2 * padding

    # Per-layer geometry: constant row stride Wp across all layers (wrap trick).
    ho, wo = [], []
    hcur, wcur = Hp, Wp
    for _ in range(S):
        hcur, wcur = hcur - k + 1, wcur - k + 1
        ho.append(hcur)
        wo.append(wcur)
    n_out = [h_ * Wp for h_ in ho]
    smax = (k - 1) * Wp + (k - 1)                    # largest tap offset
    npads = [0] * S
    npads[-1] = n_out[-1]
    for i in range(S - 2, -1, -1):                   # each layer must cover the
        npads[i] = _round_up(max(n_out[i], smax + npads[i + 1]), 128)  # next one's reads
    L = _round_up(smax + npads[0], 128)

    # Flattened zero-padded input (B, Cin0, L); NCHW is already channels-first.
    xp = jnp.pad(x_nchw.astype(jnp.float32),
                 ((0, 0), (0, 0), (padding, padding), (padding, padding)))
    xf = jnp.pad(xp.reshape(B, cin0, Hp * Wp), ((0, 0), (0, 0), (0, L - Hp * Wp)))

    operands = [xf]
    in_specs = [pl.BlockSpec((1, cin0, L), lambda b: (b, 0, 0))]
    for i in range(S):
        kk, cout_i, cin_i = conv_w_taps[i].shape
        assert masks[i].shape == (ho[i], wo[i]), (masks[i].shape, (ho[i], wo[i]))
        # Mask weight in lane layout: zeros in columns wo..Wp-1 and in the tail.
        mflat = jnp.pad(masks[i].astype(jnp.float32),
                        ((0, 0), (0, Wp - wo[i]))).reshape(1, n_out[i])
        mflat = jnp.pad(mflat, ((0, 0), (0, npads[i] - n_out[i])))
        operands += [conv_w_taps[i], conv_b[i].reshape(cout_i, 1), mflat]
        in_specs += [
            pl.BlockSpec((kk, cout_i, cin_i), lambda b: (0, 0, 0)),
            pl.BlockSpec((cout_i, 1), lambda b: (0, 0)),
            pl.BlockSpec((1, npads[i]), lambda b: (0, 0)),
        ]
    hidden = conv_w_taps[-1].shape[1]
    operands += [pred_w.reshape(1, hidden), pred_b.reshape(1, 1)]
    in_specs += [pl.BlockSpec((1, hidden), lambda b: (0, 0)),
                 pl.BlockSpec((1, 1), lambda b: (0, 0))]

    out = pl.pallas_call(
        functools.partial(_fused_predictor_kernel, k=k, wp=Wp,
                          npads=tuple(npads)),
        out_shape=jax.ShapeDtypeStruct((B, 1, npads[-1]), jnp.float32),
        grid=(B,),
        in_specs=in_specs,
        out_specs=pl.BlockSpec((1, 1, npads[-1]), lambda b: (b, 0, 0)),
        compiler_params=pltpu.CompilerParams(dimension_semantics=("parallel",)),
    )(*operands)

    out = out.reshape(B, ho[-1], Wp)[:, :, :wo[-1]]   # drop wrap columns
    return jnp.squeeze(out)                           # matches .squeeze_()


# -----------------------------------------------------------------------------
# Parameter setup (torch __init__ equivalent, deterministic synthetic init)
# -----------------------------------------------------------------------------
def mask2weight(mask2d, k, padding=0):
    """conv2d(mask, ones(k,k), padding) then reciprocal of positive counts."""
    m = jnp.pad(mask2d.astype(jnp.float32), padding)
    Ho, Wo = m.shape[0] - k + 1, m.shape[1] - k + 1
    cnt = jnp.zeros((Ho, Wo), jnp.float32)
    for dy in range(k):
        for dx in range(k):
            cnt = cnt + m[dy:dy + Ho, dx:dx + Wo]
    return jnp.where(cnt > 0, 1.0 / jnp.where(cnt > 0, cnt, 1.0), 0.0)


class Predictor:
    def __init__(self, input_size, hidden_size, k, num_stack_layers, mask2d, key):
        self.k = k
        self.padding = (k - 1) * num_stack_layers // 2
        self.masks = [mask2weight(mask2d, k, padding=self.padding)]
        for _ in range(num_stack_layers - 1):
            self.masks.append(mask2weight(self.masks[-1] > 0, k, padding=0))

        keys = jax.random.split(key, 2 * num_stack_layers + 2)
        self.conv_w_oihw, self.conv_w_taps, self.conv_b = [], [], []
        cin = input_size
        for i in range(num_stack_layers):
            bound = 1.0 / float(cin * k * k) ** 0.5    # torch Conv2d default range
            w = jax.random.uniform(keys[2 * i], (hidden_size, cin, k, k),
                                   jnp.float32, -bound, bound)
            self.conv_w_oihw.append(w)
            # tap-major kernel layout: (k*k, Cout, Cin)
            self.conv_w_taps.append(
                w.transpose(2, 3, 0, 1).reshape(k * k, hidden_size, cin))
            self.conv_b.append(jax.random.uniform(
                keys[2 * i + 1], (hidden_size,), jnp.float32, -bound, bound))
            cin = hidden_size
        bound = 1.0 / float(hidden_size) ** 0.5
        self.pred_w = jax.random.uniform(keys[-2], (1, hidden_size),
                                         jnp.float32, -bound, bound)
        self.pred_b = jax.random.uniform(keys[-1], (1,),
                                         jnp.float32, -bound, bound)

    def __call__(self, x_nchw):
        return predictor_forward(x_nchw, self.conv_w_taps, self.conv_b,
                                 self.masks, self.pred_w, self.pred_b,
                                 k=self.k, padding=self.padding)


# -----------------------------------------------------------------------------
# Pure-JAX reference (mirrors the PyTorch forward), used as a smoke check.
# -----------------------------------------------------------------------------
def _reference_forward(x, conv_w_oihw, conv_b, masks, pred_w, pred_b, *,
                       k, padding):
    h = x.astype(jnp.float32)
    pads = [padding] + [0] * (len(conv_w_oihw) - 1)
    for w, b, m, p in zip(conv_w_oihw, conv_b, masks, pads):
        h = jax.lax.conv_general_dilated(
            h, w, window_strides=(1, 1), padding=[(p, p), (p, p)],
            dimension_numbers=("NCHW", "OIHW", "NCHW"),
            precision=jax.lax.Precision.HIGHEST)
        h = jnp.maximum(h + b.reshape(1, -1, 1, 1), 0.0) * m[None, None]
    y = jnp.einsum("bchw,oc->bohw", h, pred_w,
                   precision=jax.lax.Precision.HIGHEST)
    y = y + pred_b.reshape(1, 1, 1, 1)
    return jnp.squeeze(y)


# -----------------------------------------------------------------------------
if __name__ == "__main__":
    key = jax.random.PRNGKey(0)
    k_x, k_params = jax.random.split(key)

    B, input_size, hidden_size, N = 2, 4, 32, 16
    ksz, num_stack_layers = 3, 2

    # TAN-style valid-span mask: (i, j) valid iff j >= i
    mask2d = jnp.triu(jnp.ones((N, N), dtype=bool))

    model = Predictor(input_size, hidden_size, ksz, num_stack_layers,
                      mask2d, k_params)
    x = jax.random.normal(k_x, (B, input_size, N, N), jnp.float32)

    out = jax.block_until_ready(model(x))
    assert out.shape == (B, N, N), out.shape
    assert bool(jnp.all(jnp.isfinite(out)))

    ref = jax.block_until_ready(_reference_forward(
        x, model.conv_w_oihw, model.conv_b, model.masks,
        model.pred_w, model.pred_b, k=ksz, padding=model.padding))
    assert bool(jnp.allclose(out, ref, atol=2e-2, rtol=2e-2))

    print("KERNEL_OK")
</pallas_src>

<mosaic_0001>
module attributes {stable_mosaic.version = 11 : i64} {
  func.func @_fused_predictor_kernel(%arg0: i32, %arg1: memref<1x4x512xf32, #tpu.memory_space<vmem>>, %arg2: memref<9x32x4xf32, #tpu.memory_space<vmem>>, %arg3: memref<32x1xf32, #tpu.memory_space<vmem>>, %arg4: memref<1x384xf32, #tpu.memory_space<vmem>>, %arg5: memref<9x32x32xf32, #tpu.memory_space<vmem>>, %arg6: memref<32x1xf32, #tpu.memory_space<vmem>>, %arg7: memref<1x320xf32, #tpu.memory_space<vmem>>, %arg8: memref<1x32xf32, #tpu.memory_space<vmem>>, %arg9: memref<1x1xf32, #tpu.memory_space<vmem>>, %arg10: memref<1x1x320xf32, #tpu.memory_space<vmem>>) attributes {dimension_semantics = [#tpu.dimension_semantics<parallel>], iteration_bounds = array<i64: 2>, scalar_prefetch = 0 : i64, scratch_operands = 0 : i64, tpu.core_type = #tpu.core_type<tc>, window_params = [{transform_indices = @transform_0, window_bounds = array<i64: 1, 4, 512>}, {pipeline_mode = #tpu.pipeline_mode<synchronous>, transform_indices = @transform_1, window_bounds = array<i64: 9, 32, 4>}, {pipeline_mode = #tpu.pipeline_mode<synchronous>, transform_indices = @transform_2, window_bounds = array<i64: 32, 1>}, {pipeline_mode = #tpu.pipeline_mode<synchronous>, transform_indices = @transform_3, window_bounds = array<i64: 1, 384>}, {pipeline_mode = #tpu.pipeline_mode<synchronous>, transform_indices = @transform_4, window_bounds = array<i64: 9, 32, 32>}, {pipeline_mode = #tpu.pipeline_mode<synchronous>, transform_indices = @transform_5, window_bounds = array<i64: 32, 1>}, {pipeline_mode = #tpu.pipeline_mode<synchronous>, transform_indices = @transform_6, window_bounds = array<i64: 1, 320>}, {pipeline_mode = #tpu.pipeline_mode<synchronous>, transform_indices = @transform_7, window_bounds = array<i64: 1, 32>}, {pipeline_mode = #tpu.pipeline_mode<synchronous>, transform_indices = @transform_8, window_bounds = array<i64: 1, 1>}, {transform_indices = @transform_9, window_bounds = array<i64: 1, 1, 320>}]} {
    %c0 = arith.constant 0 : index
    %c0_0 = arith.constant 0 : index
    %c0_1 = arith.constant 0 : index
    %0 = vector.load %arg1[%c0, %c0_0, %c0_1] : memref<1x4x512xf32, #tpu.memory_space<vmem>>, vector<1x4x512xf32>
    %1 = vector.shape_cast %0 : vector<1x4x512xf32> to vector<4x512xf32>
    %cst = arith.constant 0.000000e+00 : f32
    %2 = vector.broadcast %cst : f32 to vector<32x384xf32>
    %c0_2 = arith.constant 0 : index
    %c0_3 = arith.constant 0 : index
    %c0_4 = arith.constant 0 : index
    %3 = vector.load %arg2[%c0_2, %c0_3, %c0_4] : memref<9x32x4xf32, #tpu.memory_space<vmem>>, vector<1x32x4xf32>
    %4 = vector.shape_cast %3 : vector<1x32x4xf32> to vector<32x4xf32>
    %5 = vector.extract_strided_slice %1 {offsets = [0, 0], sizes = [4, 384], strides = [1, 1]} : vector<4x512xf32> to vector<4x384xf32>
    %cst_5 = arith.constant dense<0.000000e+00> : vector<32x384xf32>
    %6 = tpu.matmul %4, %5, %cst_5 {dimension_numbers = #tpu.dot_dimension_numbers<[1], [0], [0], [1], [0, 0, 1, 1], [], []>} : vector<32x4xf32>, vector<4x384xf32>, vector<32x384xf32> -> vector<32x384xf32>
    %7 = arith.addf %2, %6 : vector<32x384xf32>
    %c1 = arith.constant 1 : index
    %c0_6 = arith.constant 0 : index
    %c0_7 = arith.constant 0 : index
    %8 = vector.load %arg2[%c1, %c0_6, %c0_7] : memref<9x32x4xf32, #tpu.memory_space<vmem>>, vector<1x32x4xf32>
    %9 = vector.shape_cast %8 : vector<1x32x4xf32> to vector<32x4xf32>
    %10 = vector.extract_strided_slice %1 {offsets = [0, 1], sizes = [4, 384], strides = [1, 1]} : vector<4x512xf32> to vector<4x384xf32>
    %cst_8 = arith.constant dense<0.000000e+00> : vector<32x384xf32>
    %11 = tpu.matmul %9, %10, %cst_8 {dimension_numbers = #tpu.dot_dimension_numbers<[1], [0], [0], [1], [0, 0, 1, 1], [], []>} : vector<32x4xf32>, vector<4x384xf32>, vector<32x384xf32> -> vector<32x384xf32>
    %12 = arith.addf %7, %11 : vector<32x384xf32>
    %c2 = arith.constant 2 : index
    %c0_9 = arith.constant 0 : index
    %c0_10 = arith.constant 0 : index
    %13 = vector.load %arg2[%c2, %c0_9, %c0_10] : memref<9x32x4xf32, #tpu.memory_space<vmem>>, vector<1x32x4xf32>
    %14 = vector.shape_cast %13 : vector<1x32x4xf32> to vector<32x4xf32>
    %15 = vector.extract_strided_slice %1 {offsets = [0, 2], sizes = [4, 384], strides = [1, 1]} : vector<4x512xf32> to vector<4x384xf32>
    %cst_11 = arith.constant dense<0.000000e+00> : vector<32x384xf32>
    %16 = tpu.matmul %14, %15, %cst_11 {dimension_numbers = #tpu.dot_dimension_numbers<[1], [0], [0], [1], [0, 0, 1, 1], [], []>} : vector<32x4xf32>, vector<4x384xf32>, vector<32x384xf32> -> vector<32x384xf32>
    %17 = arith.addf %12, %16 : vector<32x384xf32>
    %c3 = arith.constant 3 : index
    %c0_12 = arith.constant 0 : index
    %c0_13 = arith.constant 0 : index
    %18 = vector.load %arg2[%c3, %c0_12, %c0_13] : memref<9x32x4xf32, #tpu.memory_space<vmem>>, vector<1x32x4xf32>
    %19 = vector.shape_cast %18 : vector<1x32x4xf32> to vector<32x4xf32>
    %20 = vector.extract_strided_slice %1 {offsets = [0, 20], sizes = [4, 384], strides = [1, 1]} : vector<4x512xf32> to vector<4x384xf32>
    %cst_14 = arith.constant dense<0.000000e+00> : vector<32x384xf32>
    %21 = tpu.matmul %19, %20, %cst_14 {dimension_numbers = #tpu.dot_dimension_numbers<[1], [0], [0], [1], [0, 0, 1, 1], [], []>} : vector<32x4xf32>, vector<4x384xf32>, vector<32x384xf32> -> vector<32x384xf32>
    %22 = arith.addf %17, %21 : vector<32x384xf32>
    %c4 = arith.constant 4 : index
    %c0_15 = arith.constant 0 : index
    %c0_16 = arith.constant 0 : index
    %23 = vector.load %arg2[%c4, %c0_15, %c0_16] : memref<9x32x4xf32, #tpu.memory_space<vmem>>, vector<1x32x4xf32>
    %24 = vector.shape_cast %23 : vector<1x32x4xf32> to vector<32x4xf32>
    %25 = vector.extract_strided_slice %1 {offsets = [0, 21], sizes = [4, 384], strides = [1, 1]} : vector<4x512xf32> to vector<4x384xf32>
    %cst_17 = arith.constant dense<0.000000e+00> : vector<32x384xf32>
    %26 = tpu.matmul %24, %25, %cst_17 {dimension_numbers = #tpu.dot_dimension_numbers<[1], [0], [0], [1], [0, 0, 1, 1], [], []>} : vector<32x4xf32>, vector<4x384xf32>, vector<32x384xf32> -> vector<32x384xf32>
    %27 = arith.addf %22, %26 : vector<32x384xf32>
    %c5 = arith.constant 5 : index
    %c0_18 = arith.constant 0 : index
    %c0_19 = arith.constant 0 : index
    %28 = vector.load %arg2[%c5, %c0_18, %c0_19] : memref<9x32x4xf32, #tpu.memory_space<vmem>>, vector<1x32x4xf32>
    %29 = vector.shape_cast %28 : vector<1x32x4xf32> to vector<32x4xf32>
    %30 = vector.extract_strided_slice %1 {offsets = [0, 22], sizes = [4, 384], strides = [1, 1]} : vector<4x512xf32> to vector<4x384xf32>
    %cst_20 = arith.constant dense<0.000000e+00> : vector<32x384xf32>
    %31 = tpu.matmul %29, %30, %cst_20 {dimension_numbers = #tpu.dot_dimension_numbers<[1], [0], [0], [1], [0, 0, 1, 1], [], []>} : vector<32x4xf32>, vector<4x384xf32>, vector<32x384xf32> -> vector<32x384xf32>
    %32 = arith.addf %27, %31 : vector<32x384xf32>
    %c6 = arith.constant 6 : index
    %c0_21 = arith.constant 0 : index
    %c0_22 = arith.constant 0 : index
    %33 = vector.load %arg2[%c6, %c0_21, %c0_22] : memref<9x32x4xf32, #tpu.memory_space<vmem>>, vector<1x32x4xf32>
    %34 = vector.shape_cast %33 : vector<1x32x4xf32> to vector<32x4xf32>
    %35 = vector.extract_strided_slice %1 {offsets = [0, 40], sizes = [4, 384], strides = [1, 1]} : vector<4x512xf32> to vector<4x384xf32>
    %cst_23 = arith.constant dense<0.000000e+00> : vector<32x384xf32>
    %36 = tpu.matmul %34, %35, %cst_23 {dimension_numbers = #tpu.dot_dimension_numbers<[1], [0], [0], [1], [0, 0, 1, 1], [], []>} : vector<32x4xf32>, vector<4x384xf32>, vector<32x384xf32> -> vector<32x384xf32>
    %37 = arith.addf %32, %36 : vector<32x384xf32>
    %c7 = arith.constant 7 : index
    %c0_24 = arith.constant 0 : index
    %c0_25 = arith.constant 0 : index
    %38 = vector.load %arg2[%c7, %c0_24, %c0_25] : memref<9x32x4xf32, #tpu.memory_space<vmem>>, vector<1x32x4xf32>
    %39 = vector.shape_cast %38 : vector<1x32x4xf32> to vector<32x4xf32>
    %40 = vector.extract_strided_slice %1 {offsets = [0, 41], sizes = [4, 384], strides = [1, 1]} : vector<4x512xf32> to vector<4x384xf32>
    %cst_26 = arith.constant dense<0.000000e+00> : vector<32x384xf32>
    %41 = tpu.matmul %39, %40, %cst_26 {dimension_numbers = #tpu.dot_dimension_numbers<[1], [0], [0], [1], [0, 0, 1, 1], [], []>} : vector<32x4xf32>, vector<4x384xf32>, vector<32x384xf32> -> vector<32x384xf32>
    %42 = arith.addf %37, %41 : vector<32x384xf32>
    %c8 = arith.constant 8 : index
    %c0_27 = arith.constant 0 : index
    %c0_28 = arith.constant 0 : index
    %43 = vector.load %arg2[%c8, %c0_27, %c0_28] : memref<9x32x4xf32, #tpu.memory_space<vmem>>, vector<1x32x4xf32>
    %44 = vector.shape_cast %43 : vector<1x32x4xf32> to vector<32x4xf32>
    %45 = vector.extract_strided_slice %1 {offsets = [0, 42], sizes = [4, 384], strides = [1, 1]} : vector<4x512xf32> to vector<4x384xf32>
    %cst_29 = arith.constant dense<0.000000e+00> : vector<32x384xf32>
    %46 = tpu.matmul %44, %45, %cst_29 {dimension_numbers = #tpu.dot_dimension_numbers<[1], [0], [0], [1], [0, 0, 1, 1], [], []>} : vector<32x4xf32>, vector<4x384xf32>, vector<32x384xf32> -> vector<32x384xf32>
    %47 = arith.addf %42, %46 : vector<32x384xf32>
    %c0_30 = arith.constant 0 : index
    %c0_31 = arith.constant 0 : index
    %48 = vector.load %arg3[%c0_30, %c0_31] : memref<32x1xf32, #tpu.memory_space<vmem>>, vector<32x1xf32>
    %49 = vector.broadcast %48 : vector<32x1xf32> to vector<32x384xf32>
    %50 = arith.addf %47, %49 : vector<32x384xf32>
    %cst_32 = arith.constant 0.000000e+00 : f32
    %51 = vector.broadcast %cst_32 : f32 to vector<32x384xf32>
    %52 = arith.maximumf %50, %51 : vector<32x384xf32>
    %c0_33 = arith.constant 0 : index
    %c0_34 = arith.constant 0 : index
    %53 = vector.load %arg4[%c0_33, %c0_34] : memref<1x384xf32, #tpu.memory_space<vmem>>, vector<1x384xf32>
    %54 = vector.broadcast %53 : vector<1x384xf32> to vector<32x384xf32>
    %55 = arith.mulf %52, %54 : vector<32x384xf32>
    %cst_35 = arith.constant 0.000000e+00 : f32
    %56 = vector.broadcast %cst_35 : f32 to vector<32x320xf32>
    %c0_36 = arith.constant 0 : index
    %c0_37 = arith.constant 0 : index
    %c0_38 = arith.constant 0 : index
    %57 = vector.load %arg5[%c0_36, %c0_37, %c0_38] : memref<9x32x32xf32, #tpu.memory_space<vmem>>, vector<1x32x32xf32>
    %58 = vector.shape_cast %57 : vector<1x32x32xf32> to vector<32x32xf32>
    %59 = vector.extract_strided_slice %55 {offsets = [0, 0], sizes = [32, 320], strides = [1, 1]} : vector<32x384xf32> to vector<32x320xf32>
    %cst_39 = arith.constant dense<0.000000e+00> : vector<32x320xf32>
    %60 = tpu.matmul %58, %59, %cst_39 {dimension_numbers = #tpu.dot_dimension_numbers<[1], [0], [0], [1], [0, 0, 1, 1], [], []>} : vector<32x32xf32>, vector<32x320xf32>, vector<32x320xf32> -> vector<32x320xf32>
    %61 = arith.addf %56, %60 : vector<32x320xf32>
    %c1_40 = arith.constant 1 : index
    %c0_41 = arith.constant 0 : index
    %c0_42 = arith.constant 0 : index
    %62 = vector.load %arg5[%c1_40, %c0_41, %c0_42] : memref<9x32x32xf32, #tpu.memory_space<vmem>>, vector<1x32x32xf32>
    %63 = vector.shape_cast %62 : vector<1x32x32xf32> to vector<32x32xf32>
    %64 = vector.extract_strided_slice %55 {offsets = [0, 1], sizes = [32, 320], strides = [1, 1]} : vector<32x384xf32> to vector<32x320xf32>
    %cst_43 = arith.constant dense<0.000000e+00> : vector<32x320xf32>
    %65 = tpu.matmul %63, %64, %cst_43 {dimension_numbers = #tpu.dot_dimension_numbers<[1], [0], [0], [1], [0, 0, 1, 1], [], []>} : vector<32x32xf32>, vector<32x320xf32>, vector<32x320xf32> -> vector<32x320xf32>
    %66 = arith.addf %61, %65 : vector<32x320xf32>
    %c2_44 = arith.constant 2 : index
    %c0_45 = arith.constant 0 : index
    %c0_46 = arith.constant 0 : index
    %67 = vector.load %arg5[%c2_44, %c0_45, %c0_46] : memref<9x32x32xf32, #tpu.memory_space<vmem>>, vector<1x32x32xf32>
    %68 = vector.shape_cast %67 : vector<1x32x32xf32> to vector<32x32xf32>
    %69 = vector.extract_strided_slice %55 {offsets = [0, 2], sizes = [32, 320], strides = [1, 1]} : vector<32x384xf32> to vector<32x320xf32>
    %cst_47 = arith.constant dense<0.000000e+00> : vector<32x320xf32>
    %70 = tpu.matmul %68, %69, %cst_47 {dimension_numbers = #tpu.dot_dimension_numbers<[1], [0], [0], [1], [0, 0, 1, 1], [], []>} : vector<32x32xf32>, vector<32x320xf32>, vector<32x320xf32> -> vector<32x320xf32>
    %71 = arith.addf %66, %70 : vector<32x320xf32>
    %c3_48 = arith.constant 3 : index
    %c0_49 = arith.constant 0 : index
    %c0_50 = arith.constant 0 : index
    %72 = vector.load %arg5[%c3_48, %c0_49, %c0_50] : memref<9x32x32xf32, #tpu.memory_space<vmem>>, vector<1x32x32xf32>
    %73 = vector.shape_cast %72 : vector<1x32x32xf32> to vector<32x32xf32>
    %74 = vector.extract_strided_slice %55 {offsets = [0, 20], sizes = [32, 320], strides = [1, 1]} : vector<32x384xf32> to vector<32x320xf32>
    %cst_51 = arith.constant dense<0.000000e+00> : vector<32x320xf32>
    %75 = tpu.matmul %73, %74, %cst_51 {dimension_numbers = #tpu.dot_dimension_numbers<[1], [0], [0], [1], [0, 0, 1, 1], [], []>} : vector<32x32xf32>, vector<32x320xf32>, vector<32x320xf32> -> vector<32x320xf32>
    %76 = arith.addf %71, %75 : vector<32x320xf32>
    %c4_52 = arith.constant 4 : index
    %c0_53 = arith.constant 0 : index
    %c0_54 = arith.constant 0 : index
    %77 = vector.load %arg5[%c4_52, %c0_53, %c0_54] : memref<9x32x32xf32, #tpu.memory_space<vmem>>, vector<1x32x32xf32>
    %78 = vector.shape_cast %77 : vector<1x32x32xf32> to vector<32x32xf32>
    %79 = vector.extract_strided_slice %55 {offsets = [0, 21], sizes = [32, 320], strides = [1, 1]} : vector<32x384xf32> to vector<32x320xf32>
    %cst_55 = arith.constant dense<0.000000e+00> : vector<32x320xf32>
    %80 = tpu.matmul %78, %79, %cst_55 {dimension_numbers = #tpu.dot_dimension_numbers<[1], [0], [0], [1], [0, 0, 1, 1], [], []>} : vector<32x32xf32>, vector<32x320xf32>, vector<32x320xf32> -> vector<32x320xf32>
    %81 = arith.addf %76, %80 : vector<32x320xf32>
    %c5_56 = arith.constant 5 : index
    %c0_57 = arith.constant 0 : index
    %c0_58 = arith.constant 0 : index
    %82 = vector.load %arg5[%c5_56, %c0_57, %c0_58] : memref<9x32x32xf32, #tpu.memory_space<vmem>>, vector<1x32x32xf32>
    %83 = vector.shape_cast %82 : vector<1x32x32xf32> to vector<32x32xf32>
    %84 = vector.extract_strided_slice %55 {offsets = [0, 22], sizes = [32, 320], strides = [1, 1]} : vector<32x384xf32> to vector<32x320xf32>
    %cst_59 = arith.constant dense<0.000000e+00> : vector<32x320xf32>
    %85 = tpu.matmul %83, %84, %cst_59 {dimension_numbers = #tpu.dot_dimension_numbers<[1], [0], [0], [1], [0, 0, 1, 1], [], []>} : vector<32x32xf32>, vector<32x320xf32>, vector<32x320xf32> -> vector<32x320xf32>
    %86 = arith.addf %81, %85 : vector<32x320xf32>
    %c6_60 = arith.constant 6 : index
    %c0_61 = arith.constant 0 : index
    %c0_62 = arith.constant 0 : index
    %87 = vector.load %arg5[%c6_60, %c0_61, %c0_62] : memref<9x32x32xf32, #tpu.memory_space<vmem>>, vector<1x32x32xf32>
    %88 = vector.shape_cast %87 : vector<1x32x32xf32> to vector<32x32xf32>
    %89 = vector.extract_strided_slice %55 {offsets = [0, 40], sizes = [32, 320], strides = [1, 1]} : vector<32x384xf32> to vector<32x320xf32>
    %cst_63 = arith.constant dense<0.000000e+00> : vector<32x320xf32>
    %90 = tpu.matmul %88, %89, %cst_63 {dimension_numbers = #tpu.dot_dimension_numbers<[1], [0], [0], [1], [0, 0, 1, 1], [], []>} : vector<32x32xf32>, vector<32x320xf32>, vector<32x320xf32> -> vector<32x320xf32>
    %91 = arith.addf %86, %90 : vector<32x320xf32>
    %c7_64 = arith.constant 7 : index
    %c0_65 = arith.constant 0 : index
    %c0_66 = arith.constant 0 : index
    %92 = vector.load %arg5[%c7_64, %c0_65, %c0_66] : memref<9x32x32xf32, #tpu.memory_space<vmem>>, vector<1x32x32xf32>
    %93 = vector.shape_cast %92 : vector<1x32x32xf32> to vector<32x32xf32>
    %94 = vector.extract_strided_slice %55 {offsets = [0, 41], sizes = [32, 320], strides = [1, 1]} : vector<32x384xf32> to vector<32x320xf32>
    %cst_67 = arith.constant dense<0.000000e+00> : vector<32x320xf32>
    %95 = tpu.matmul %93, %94, %cst_67 {dimension_numbers = #tpu.dot_dimension_numbers<[1], [0], [0], [1], [0, 0, 1, 1], [], []>} : vector<32x32xf32>, vector<32x320xf32>, vector<32x320xf32> -> vector<32x320xf32>
    %96 = arith.addf %91, %95 : vector<32x320xf32>
    %c8_68 = arith.constant 8 : index
    %c0_69 = arith.constant 0 : index
    %c0_70 = arith.constant 0 : index
    %97 = vector.load %arg5[%c8_68, %c0_69, %c0_70] : memref<9x32x32xf32, #tpu.memory_space<vmem>>, vector<1x32x32xf32>
    %98 = vector.shape_cast %97 : vector<1x32x32xf32> to vector<32x32xf32>
    %99 = vector.extract_strided_slice %55 {offsets = [0, 42], sizes = [32, 320], strides = [1, 1]} : vector<32x384xf32> to vector<32x320xf32>
    %cst_71 = arith.constant dense<0.000000e+00> : vector<32x320xf32>
    %100 = tpu.matmul %98, %99, %cst_71 {dimension_numbers = #tpu.dot_dimension_numbers<[1], [0], [0], [1], [0, 0, 1, 1], [], []>} : vector<32x32xf32>, vector<32x320xf32>, vector<32x320xf32> -> vector<32x320xf32>
    %101 = arith.addf %96, %100 : vector<32x320xf32>
    %c0_72 = arith.constant 0 : index
    %c0_73 = arith.constant 0 : index
    %102 = vector.load %arg6[%c0_72, %c0_73] : memref<32x1xf32, #tpu.memory_space<vmem>>, vector<32x1xf32>
    %103 = vector.broadcast %102 : vector<32x1xf32> to vector<32x320xf32>
    %104 = arith.addf %101, %103 : vector<32x320xf32>
    %cst_74 = arith.constant 0.000000e+00 : f32
    %105 = vector.broadcast %cst_74 : f32 to vector<32x320xf32>
    %106 = arith.maximumf %104, %105 : vector<32x320xf32>
    %c0_75 = arith.constant 0 : index
    %c0_76 = arith.constant 0 : index
    %107 = vector.load %arg7[%c0_75, %c0_76] : memref<1x320xf32, #tpu.memory_space<vmem>>, vector<1x320xf32>
    %108 = vector.broadcast %107 : vector<1x320xf32> to vector<32x320xf32>
    %109 = arith.mulf %106, %108 : vector<32x320xf32>
    %c0_77 = arith.constant 0 : index
    %c0_78 = arith.constant 0 : index
    %110 = vector.load %arg8[%c0_77, %c0_78] : memref<1x32xf32, #tpu.memory_space<vmem>>, vector<1x32xf32>
    %cst_79 = arith.constant dense<0.000000e+00> : vector<1x320xf32>
    %111 = tpu.matmul %110, %109, %cst_79 {dimension_numbers = #tpu.dot_dimension_numbers<[1], [0], [0], [1], [0, 0, 1, 1], [], []>} : vector<1x32xf32>, vector<32x320xf32>, vector<1x320xf32> -> vector<1x320xf32>
    %c0_80 = arith.constant 0 : index
    %c0_81 = arith.constant 0 : index
    %112 = vector.load %arg9[%c0_80, %c0_81] : memref<1x1xf32, #tpu.memory_space<vmem>>, vector<1x1xf32>
    %113 = vector.broadcast %112 : vector<1x1xf32> to vector<1x320xf32>
    %114 = arith.addf %111, %113 : vector<1x320xf32>
    %c0_82 = arith.constant 0 : index
    %c0_83 = arith.constant 0 : index
    %c0_84 = arith.constant 0 : index
    %115 = vector.load %arg10[%c0_82, %c0_83, %c0_84] : memref<1x1x320xf32, #tpu.memory_space<vmem>>, vector<1x1x320xf32>
    %116 = vector.shape_cast %115 : vector<1x1x320xf32> to vector<1x320xf32>
    %117 = vector.shape_cast %114 : vector<1x320xf32> to vector<1x1x320xf32>
    tpu.vector_store %arg10[%c0_82, %c0_83, %c0_84], %117 {strides = array<i32>} : memref<1x1x320xf32, #tpu.memory_space<vmem>>, vector<1x1x320xf32>,
    return
  }
  func.func @transform_0(%arg0: i32) -> (i32, i32, i32) {
    %c0_i32 = arith.constant 0 : i32
    %c0_i32_0 = arith.constant 0 : i32
    %c0_i32_1 = arith.constant 0 : i32
    return %arg0, %c0_i32, %c0_i32_0 : i32, i32, i32
  }
  func.func @transform_1(%arg0: i32) -> (i32, i32, i32) {
    %c0_i32 = arith.constant 0 : i32
    %c0_i32_0 = arith.constant 0 : i32
    %c0_i32_1 = arith.constant 0 : i32
    %c0_i32_2 = arith.constant 0 : i32
    return %c0_i32, %c0_i32_0, %c0_i32_1 : i32, i32, i32
  }
  func.func @transform_2(%arg0: i32) -> (i32, i32) {
    %c0_i32 = arith.constant 0 : i32
    %c0_i32_0 = arith.constant 0 : i32
    %c0_i32_1 = arith.constant 0 : i32
    return %c0_i32, %c0_i32_0 : i32, i32
  }
  func.func @transform_3(%arg0: i32) -> (i32, i32) {
    %c0_i32 = arith.constant 0 : i32
    %c0_i32_0 = arith.constant 0 : i32
    %c0_i32_1 = arith.constant 0 : i32
    return %c0_i32, %c0_i32_0 : i32, i32
  }
  func.func @transform_4(%arg0: i32) -> (i32, i32, i32) {
    %c0_i32 = arith.constant 0 : i32
    %c0_i32_0 = arith.constant 0 : i32
    %c0_i32_1 = arith.constant 0 : i32
    %c0_i32_2 = arith.constant 0 : i32
    return %c0_i32, %c0_i32_0, %c0_i32_1 : i32, i32, i32
  }
  func.func @transform_5(%arg0: i32) -> (i32, i32) {
    %c0_i32 = arith.constant 0 : i32
    %c0_i32_0 = arith.constant 0 : i32
    %c0_i32_1 = arith.constant 0 : i32
    return %c0_i32, %c0_i32_0 : i32, i32
  }
  func.func @transform_6(%arg0: i32) -> (i32, i32) {
    %c0_i32 = arith.constant 0 : i32
    %c0_i32_0 = arith.constant 0 : i32
    %c0_i32_1 = arith.constant 0 : i32
    return %c0_i32, %c0_i32_0 : i32, i32
  }
  func.func @transform_7(%arg0: i32) -> (i32, i32) {
    %c0_i32 = arith.constant 0 : i32
    %c0_i32_0 = arith.constant 0 : i32
    %c0_i32_1 = arith.constant 0 : i32
    return %c0_i32, %c0_i32_0 : i32, i32
  }
  func.func @transform_8(%arg0: i32) -> (i32, i32) {
    %c0_i32 = arith.constant 0 : i32
    %c0_i32_0 = arith.constant 0 : i32
    %c0_i32_1 = arith.constant 0 : i32
    return %c0_i32, %c0_i32_0 : i32, i32
  }
  func.func @transform_9(%arg0: i32) -> (i32, i32, i32) {
    %c0_i32 = arith.constant 0 : i32
    %c0_i32_0 = arith.constant 0 : i32
    %c0_i32_1 = arith.constant 0 : i32
    return %arg0, %c0_i32, %c0_i32_0 : i32, i32, i32
  }
}

</mosaic_0001>

<bundles_post_ra>
// kernel: tpu_custom_call.1
= control target key start
LH: loop header
LB: loop body
LE: loop exit
PB: predicated region body
PF: predicated region fallthrough
CT: control target
= control target key end

     0   :  { %s7518_s0 = inlined_call_operand.vmem [shape: f32[2,4,512], index: 0, kind: input, shape index: {}]   ;;  %s7519_s1 = inlined_call_operand.vmem [shape: f32[9,32,4], index: 1, kind: input, shape index: {}]   ;;  %s7520_s2 = inlined_call_operand.vmem [shape: f32[32,1], index: 2, kind: input, shape index: {}]   ;;  %s7521_s3 = inlined_call_operand.vmem [shape: f32[1,384], index: 3, kind: input, shape index: {}]   ;;  %s7522_s4 = inlined_call_operand.vmem [shape: f32[9,32,32], index: 4, kind: input, shape index: {}]   ;;  %s7523_s5 = inlined_call_operand.vmem [shape: f32[32,1], index: 5, kind: input, shape index: {}]   ;;  %s7524_s6 = inlined_call_operand.vmem [shape: f32[1,320], index: 6, kind: input, shape index: {}]   ;;  %s7525_s7 = inlined_call_operand.vmem [shape: f32[1,32], index: 7, kind: input, shape index: {}]   ;;  %s7526_s8 = inlined_call_operand.<no memory space> [shape: f32[1,1], index: 8, kind: input, shape index: {}]   ;;  %s7527_s9 = inlined_call_operand.hbm [shape: f32[2,1,320], index: 9, kind: output, shape index: {}]  }
   0x1   :  { %v14_v0 = vstv %s7526_s8 }
   0x2   :  { %15 = vst [vmem:[#allocation2] sm:$0x1] %v14_v0 }
   0x3   :  { %16 = vsyncpa [#allocation4], 0 }
   0x4   :  { %18 = vsyncpa [#allocation4 + $0x1], 0  ;;  %s6232_s11 = smov 0   ;;  %s6234_s12 = smov 0  }
   0x5   :  { %s6236_s13 = smov 0   ;;  %s6238_s14 = smov 0  }
   0x6 LB: > { %s6253_s8 = sadd.s32 4294967295, %s6163_s14   ;;  %s4875_s15 = sadd.s32 4294967294, %s6163_s14   ;;  %s6163_s14 = sphi %s6238_s14, %s7574_s14   ;;  %s6159_s13 = sphi %s6236_s13, %s7573_s13   ;;  %s6155_s12 = sphi %s6234_s12, %s7572_s12   ;;  %s6151_s11 = sphi %s6232_s11, %s7571_s11  }
   0x7   : > { %s6257_s16 = sadd.s32 1, %s6163_s14   ;;  %s225_s17 = sadd.s32 1, %s6159_s13 }
   0x8   : > { %s222_s18 = ssub.s32 %s6163_s14, %s6257_s16  ;;  %p235_p0 = scmp.ne.s32.totalorder %s6159_s13, %s6155_s12 }
   0x9   : > { %p223_p1 = scmp.eq.s32.totalorder %s222_s18, 0  ;;  %p236_p2 = scmp.eq.s32.totalorder %s6253_s8, 1 }
   0xa   : > { %p241_p3 = scmp.ne.s32.totalorder %s6155_s12, %s6151_s11  ;;  %p242_p4 = scmp.eq.s32.totalorder %s4875_s15, 1 }
   0xb   : > { %s6268_s19 = scalar_select %p223_p1, %s6159_s13, %s225_s17  }
   0xc   : > { %p6270_p5 = por %p236_p2, %p235_p0  ;;  %p6274_p6 = por %p242_p4, %p241_p3 }
   0xd   : > { %p4878_p7 = scmp.ge.s32.totalorder %s6163_s14, 1  ;;  %p292_p8 = scmp.lt.s32.totalorder %s6163_s14, 3 }
   0xf   : > { %p293_p9 = pnand %p4878_p7, %p292_p8 }
  0x10   : > { %p328_p10 = scmp.lt.s32.totalorder (!%p293_p9), %s6253_s8, 1  ;;  %v7543_v1 = vmov (!%p293_p9), 0.0   ;;  %v4881_v2 = vld [vmem:[%s7519_s1 + $0x20] sm:$0xff] (!%p293_p9)  ;;  %vm360_vm0 = vcmask (!%p293_p9), 31744   ;;  %s6166_s29 = smov (!%p293_p9), 127   ;;  %vm356_vm1 = vcmask (!%p293_p9), 1039360  }
  0x11   : > { %296 = sbr.rel (%p293_p9) target bundleno = 1215 (0x4bf), region = 56  ;;  %444 = vmatprep.mubr.f32.mxu0 (!%p293_p9), %v7543_v1  ;;  %5246 = vmatprep.mubr.msk.f32.mxu1 (!%p293_p9), %vm360_vm0, %v4881_v2  ;;  %s6167_s30 = smov (!%p293_p9), 126   ;;  %vm373_vm2 = vcmask (!%p293_p9), 1043456   ;;  %vm759_vm3 = vcmask (!%p293_p9), 1031168   ;;  %v4882_v15 = vld [vmem:[%s7519_s1 + $0x28] sm:$0xff] (!%p293_p9)  ;;  %v4883_v20 = vld [vmem:[%s7519_s1 + $0x30] sm:$0xff] (!%p293_p9) }
  0x12   : > { %s6168_s10 = smov (!%p293_p9), 108   ;;  %s6169_s15 = smov (!%p293_p9), 107   ;;  %v4884_v23 = vld [vmem:[%s7519_s1 + $0x38] sm:$0xff] (!%p293_p9)  ;;  %v335_v24 = vld [vmem:[%s7519_s1] sm:$0xff] (!%p293_p9)  ;;  %v2294_v27 = vld [vmem:[%s7520_s2 + $0x8] sm:$0xff] (!%p293_p9)  ;;  %vm980_vm4 = vcmask (!%p293_p9), 883712  }
  0x13   : > { %s6170_s17 = smov (!%p293_p9), 106   ;;  %s6171_s18 = smov (!%p293_p9), 88   ;;  %v336_v28 = vld [vmem:[%s7519_s1 + $0x8] sm:$0xff] (!%p293_p9)  ;;  %v6174_v32 = vmov (!%p293_p9), 0   ;;  %v337_v33 = vld [vmem:[%s7519_s1 + $0x10] sm:$0xff] (!%p293_p9)  ;;  %v338_v37 = vld [vmem:[%s7519_s1 + $0x18] sm:$0xff] (!%p293_p9) }
  0x14   : > { %s7528_s23 = smov (!%p293_p9), 86   ;;  %5858 = vset.pattern.permute.xlu1 (!%p293_p9), %v6174_v32  ;;  %5857 = vset.pattern.permute.xlu0 (!%p293_p9), %v6174_v32  ;;  %v4907_v38 = vld [vmem:[%s7519_s1 + $0x40] sm:$0xff] (!%p293_p9)  ;;  %v2295_v41 = vld [vmem:[%s7520_s2 + $0x10] sm:$0xff] (!%p293_p9)  ;;  %v4908_v43 = vld [vmem:[%s7519_s1 + $0x48] sm:$0xff] (!%p293_p9)  ;;  %vm1201_vm5 = vcmask (!%p293_p9), 875520   ;;  %vm1422_vm6 = vcmask (!%p293_p9), 867328  }
  0x15   : > { %v2293_v40 = vld [vmem:[%s7520_s2] sm:$0xff] (!%p293_p9)  ;;  %v4909_v44 = vld [vmem:[%s7519_s1 + $0x50] sm:$0xff] (!%p293_p9)  ;;  %v2296_v46 = vld [vmem:[%s7520_s2 + $0x18] sm:$0xff] (!%p293_p9)  ;;  %vm1643_vm7 = vcmask (!%p293_p9), 719872   ;;  %vm1864_vm8 = vcmask (!%p293_p9), 711680   ;;  %vm2085_vm9 = vcmask (!%p293_p9), 703488  }
  0x16   : > { %v4910_v49 = vld [vmem:[%s7519_s1 + $0x58] sm:$0xff] (!%p293_p9)  ;;  %v4922_v50 = vld [vmem:[%s7519_s1 + $0x60] sm:$0xff] (!%p293_p9)  ;;  %v4923_v52 = vld [vmem:[%s7519_s1 + $0x68] sm:$0xff] (!%p293_p9)  ;;  %vm2435_vm10 = vcmask (!%p293_p9), 261120   ;;  %vm6176_vm11 = vmmov (!%p293_p9), 0   ;;  %s325_s24 = sand.u32 (!%p293_p9), 1, %s6155_s12  }
  0x17   : > { %v6461_v55 = vld [vmem:[%s7519_s1 + $0x70] sm:$0xff] (!%p293_p9)  ;;  %v6474_v58 = vld [vmem:[%s7519_s1 + $0x78] sm:$0xff] (!%p293_p9)  ;;  %v6484_v61 = vld [vmem:[%s7519_s1 + $0x80] sm:$0xff] (!%p293_p9) }
  0x18   : > { %s329_s22 = scalar_select %p328_p10, %s6253_s8, 1  ;;  %v6497_v62 = vld [vmem:[%s7519_s1 + $0x88] sm:$0xff]  ;;  %v6502_v63 = vld [vmem:[%s7519_s1 + $0x90] sm:$0xff] }
  0x1a   : > { %s5121_s25 = sshll.u32 %s329_s22, 4  ;;  %s7530_s22 = smov 87  }
  0x1b   : > { %s332_s28 = scalar_lea.vmem %s7518_s0, %s5121_s25  ;;  %s5803_s25 = smul.u32 3, %s325_s24 }
  0x1c   : > { %v333_v3 = vld [vmem:[%s332_s28] sm:$0xff]  ;;  %v6292_v5 = vld [vmem:[%s332_s28 + $0x8] sm:$0xff] }
  0x1d   : > { %348 = vrot.lane.b32.xlu1 %v333_v3, %s6166_s29  ;;  %v346_v4 = vcombine.high %v333_v3, %v333_v3  ;;  %v347_v6 = vcombine.high %v6292_v5, %v6292_v5  ;;  %s327_s26 = scalar_lea.vmem [#allocation3], %s5803_s25 }
  0x1f   : > { %350 = vrot.lane.b32.xlu0 %v346_v4, %s6166_s29 }
  0x21   : > { %753 = vrot.lane.b32.xlu1 %v346_v4, %s6167_s30 }
  0x23   : > { %352 = vrot.lane.b32.xlu0 %v6292_v5, %s6166_s29 }
  0x25   : > { %751 = vrot.lane.b32.xlu1 %v333_v3, %s6167_s30 }
  0x27   : > { %755 = vrot.lane.b32.xlu0 %v6292_v5, %s6167_s30 }
  0x29   : > { %974 = vrot.lane.b32.xlu1 %v346_v4, %s6168_s10 }
  0x2b   : > { %354 = vrot.lane.b32.xlu0 %v347_v6, %s6166_s29 }
  0x2d   : > { %972 = vrot.lane.b32.xlu1 %v333_v3, %s6168_s10 }
  0x2f   : > { %976 = vrot.lane.b32.xlu0 %v6292_v5, %s6168_s10 }
  0x31   : > { %1195 = vrot.lane.b32.xlu1 %v346_v4, %s6169_s15 }
  0x33   : > { %757 = vrot.lane.b32.xlu0 %v347_v6, %s6167_s30 }
  0x35   : > { %978 = vrot.lane.b32.xlu1 %v347_v6, %s6168_s10 }
  0x37   : > { %1197 = vrot.lane.b32.xlu0 %v6292_v5, %s6169_s15 }
  0x39   : > { %1199 = vrot.lane.b32.xlu1 %v347_v6, %s6169_s15 }
  0x3b   : > { %1193 = vrot.lane.b32.xlu0 %v333_v3, %s6169_s15 }
  0x3d   : > { %1418 = vrot.lane.b32.xlu1 %v6292_v5, %s6170_s17 }
  0x3f   : > { %1416 = vrot.lane.b32.xlu0 %v346_v4, %s6170_s17 }
  0x41   : > { %1420 = vrot.lane.b32.xlu1 %v347_v6, %s6170_s17 }
  0x43   : > { %1414 = vrot.lane.b32.xlu0 %v333_v3, %s6170_s17 }
  0x45   : > { %1641 = vrot.lane.b32.xlu1 %v347_v6, %s6171_s18 }
  0x47   : > { %1639 = vrot.lane.b32.xlu0 %v6292_v5, %s6171_s18 }
  0x49   : > { %1635 = vrot.lane.b32.xlu1 %v333_v3, %s6171_s18 }
  0x4b   : > { %1637 = vrot.lane.b32.xlu0 %v346_v4, %s6171_s18 }
  0x4d   : > { %1862 = vrot.lane.b32.xlu1 %v347_v6, %s7530_s22 }
  0x4f   : > { %1860 = vrot.lane.b32.xlu0 %v6292_v5, %s7530_s22 }
  0x51   : > { %2083 = vrot.lane.b32.xlu1 %v347_v6, %s7528_s23  ;;  %v6537_v6 = vld [vmem:[%s7519_s1 + $0xa8] sm:$0xff] }
  0x53   : > { %2081 = vrot.lane.b32.xlu0 %v6292_v5, %s7528_s23 }
  0x55   : > { %1856 = vrot.lane.b32.xlu1 %v333_v3, %s7530_s22 }
  0x57   : > { %1858 = vrot.lane.b32.xlu0 %v346_v4, %s7530_s22 }
  0x59   : > { %2077 = vrot.lane.b32.xlu1 %v333_v3, %s7528_s23 }
  0x5b   : > { %2079 = vrot.lane.b32.xlu0 %v346_v4, %s7528_s23  ;;  %s5804_s23 = smul.u32 48, %s6253_s8  ;;  %s6178_s8 = smov [#allocation3]  }
  0x5c   : > { %s6105_s22 = sshll.u32 %s6178_s8, 4  ;;  %s6106_s22 = int_to_ptr.vmem [resolvable:$false] %s6105_s22 }
  0x5d   : > { %2304 = vperm.xlu1 %5858, %v2294_v27   ;;  %v4997_v27 = vld [vmem:[%s7519_s1 + $0x100] sm:$0xff]  ;;  %s6107_s27 = scalar_lea.vmem %s6106_s22, 96 }
  0x5f   : > { %2299 = vperm.xlu0 %5857, %v2293_v40   ;;  %v7532_v40 = vlaneseq }
  0x61   : > { %2309 = vperm.xlu1 %5858, %v2295_v41   ;;  %v6717_v41 = vshrl.u32 %v7532_v40, 7 }
  0x63   : > { %2314 = vperm.xlu0 %5857, %v2296_v46  }
  0x8f   : > { %v349_v7 = vpop.permute.xlu1 %348 }
  0x91   : > { %v351_v8 = vpop.permute.xlu0 %350 }
  0x92   : > { %v357_v12 = vsel %vm356_vm1, %v349_v7, %v351_v8 }
  0x93   : > { %v754_v9 = vpop.permute.xlu1 %753 }
  0x95   : > { %v353_v10 = vpop.permute.xlu0 %352 }
  0x96   : > { %v358_v11 = vsel %vm356_vm1, %v351_v8, %v353_v10 }
  0x97   : > { %4885 = vmatprep.subr.msk.mxu0 %vm373_vm2, %v358_v11  ;;  %v752_v13 = vpop.permute.xlu1 %751 }
  0x98   : > { %4886 = vmatpush1.msk.msra.mxu0 %vm373_vm2, %v357_v12  ;;  %v760_v30 = vsel %vm759_vm3, %v752_v13, %v754_v9  ;;  %v6562_v13 = vld [vmem:[%s7519_s1 + $0xb8] sm:$0xff] }
  0x99   : > { %4887 = vmatmul.mubr.msk.f32.vlgmr.msra.gmra.mrb[0].mxu0 %vm360_vm0, %v4881_v2  ;;  %v756_v14 = vpop.permute.xlu0 %755  ;;  %4896 = vmatprep.subr.msk.mxu0 %vm373_vm2, %v346_v4  ;;  %v6519_v4 = vld [vmem:[%s7519_s1 + $0x98] sm:$0xff] }
  0x9a   : > { %450 = vmatprep.mubr.f32.mxu0 %v7543_v1  ;;  %4897 = vmatpush1.msk.msra.mxu0 %vm373_vm2, %v333_v3  ;;  %v761_v16 = vsel %vm759_vm3, %v754_v9, %v756_v14 }
  0x9b   : > { %4911 = vmatprep.subr.msk.mxu0 %vm373_vm2, %v761_v16  ;;  %v6347_v17 = vpop.permute.xlu1 %974 }
  0x9d   : > { %4888 = vmatmul.mubr.msk.f32.gmra.mrb[2].mxu0 %vm360_vm0, %v4882_v15  ;;  %v355_v18 = vpop.permute.xlu0 %354 }
  0x9e   : > { %v359_v19 = vsel %vm356_vm1, %v353_v10, %v355_v18  ;;  %456 = vmatprep.mubr.f32.mxu0 %v7543_v1  ;;  %v6547_v10 = vld [vmem:[%s7519_s1 + $0xb0] sm:$0xff] }
  0x9f   : > { %5244 = vmatprep.subr.msk.mxu1 %vm373_vm2, %v359_v19  ;;  %v6356_v21 = vpop.permute.xlu1 %972  ;;  %v6588_v18 = vld [vmem:[%s7519_s1 + $0xd0] sm:$0xff] }
  0xa0   : > { %5245 = vmatpush3.msk.msra.mxu1 %vm373_vm2, %v359_v19  ;;  %v981_v54 = vsel %vm980_vm4, %v6356_v21, %v6347_v17  ;;  %v6605_v21 = vld [vmem:[%s7519_s1 + $0xe0] sm:$0xff] }
  0xa1   : > { %4889 = vmatmul.mubr.msk.f32.gmra.mrb[4].mxu0 %vm360_vm0, %v4883_v20  ;;  %5247 = vmatmul.mubr.msk.f32.vlgmr.msra.gmra.mrb[0].mxu1 %vm360_vm0, %v4882_v15  ;;  %v977_v22 = vpop.permute.xlu0 %976  ;;  %v6583_v15 = vld [vmem:[%s7519_s1 + $0xc8] sm:$0xff] }
  0xa2   : > { %462 = vmatprep.mubr.f32.mxu0 %v7543_v1  ;;  %5249 = vmatprep.mubr.msk.f32.mxu1 %vm360_vm0, %v4883_v20  ;;  %v982_v34 = vsel %vm980_vm4, %v6347_v17, %v977_v22  ;;  %v4970_v20 = vld [vmem:[%s7519_s1 + $0xd8] sm:$0xff] }
  0xa3   : > { %5252 = vmatprep.subr.msk.mxu1 %vm373_vm2, %v6292_v5  ;;  %v6371_v25 = vpop.permute.xlu1 %1195 }
  0xa4   : > { %5253 = vmatpush3.msk.msra.mxu1 %vm373_vm2, %v6292_v5  ;;  %v6525_v5 = vld [vmem:[%s7519_s1 + $0xa0] sm:$0xff] }
  0xa5   : > { %4890 = vmatmul.mubr.msk.f32.gmra.mrb[6].mxu0 %vm360_vm0, %v4884_v23  ;;  %5250 = vmatmul.mubr.msk.f32.gmra.mrb[2].mxu1 %vm360_vm0, %v4884_v23  ;;  %v758_v26 = vpop.permute.xlu0 %757 }
  0xa6   : > { %636 = vmatprep.mubr.f32.mxu0 %v7543_v1  ;;  %5254 = vmatprep.mubr.msk.f32.mxu1 %vm360_vm0, %v335_v24  ;;  %v762_v29 = vsel %vm759_vm3, %v756_v14, %v758_v26  ;;  %v6570_v14 = vld [vmem:[%s7519_s1 + $0xc0] sm:$0xff]  ;;  %v4985_v26 = vld [vmem:[%s7519_s1 + $0xf8] sm:$0xff] }
  0xa7   : > { %5260 = vmatprep.subr.msk.mxu1 %vm373_vm2, %v762_v29  ;;  %v979_v31 = vpop.permute.xlu1 %978 }
  0xa8   : > { %v983_v35 = vsel %vm980_vm4, %v977_v22, %v979_v31  ;;  %v4983_v22 = vld [vmem:[%s7519_s1 + $0xe8] sm:$0xff] }
  0xa9   : > { %4898 = vmatmul.mubr.msk.f32.vlgmr.msra.gmra.mrb[0].mxu0 %vm360_vm0, %v335_v24  ;;  %5255 = vmatmul.mubr.msk.f32.vlgmr.msra.gmra.mrb[0].mxu1 %vm360_vm0, %v336_v28  ;;  %v1198_v36 = vpop.permute.xlu0 %1197  ;;  %v4984_v24 = vld [vmem:[%s7519_s1 + $0xf0] sm:$0xff] }
  0xaa   : > { %4912 = vmatpush1.msk.msra.mxu0 %vm373_vm2, %v760_v30  ;;  %642 = vmatprep.mubr.f32.mxu0 %v7543_v1  ;;  %v1203_v56 = vsel %vm1201_vm5, %v6371_v25, %v1198_v36  ;;  %v5000_v30 = vld [vmem:[%s7519_s1 + $0x118] sm:$0xff] }
  0xab   : > { %5257 = vmatprep.mubr.msk.f32.mxu1 %vm360_vm0, %v337_v33  ;;  %5261 = vmatpush3.msk.msra.mxu1 %vm373_vm2, %v762_v29  ;;  %v1200_v39 = vpop.permute.xlu1 %1199  ;;  %v4999_v29 = vld [vmem:[%s7519_s1 + $0x110] sm:$0xff] }
  0xac   : > { %5268 = vmatprep.subr.msk.mxu1 %vm373_vm2, %v983_v35  ;;  %4926 = vmatprep.subr.msk.mxu0 %vm373_vm2, %v982_v34  ;;  %v1204_v47 = vsel %vm1201_vm5, %v1198_v36, %v1200_v39 }
  0xad   : > { %4899 = vmatmul.mubr.msk.f32.gmra.mrb[2].mxu0 %vm360_vm0, %v336_v28  ;;  %5258 = vmatmul.mubr.msk.f32.gmra.mrb[2].mxu1 %vm360_vm0, %v338_v37  ;;  %v6416_v42 = vpop.permute.xlu0 %1193  ;;  %v4998_v28 = vld [vmem:[%s7519_s1 + $0x108] sm:$0xff] }
  0xae   : > { %648 = vmatprep.mubr.f32.mxu0 %v7543_v1  ;;  %5262 = vmatprep.mubr.msk.f32.mxu1 %vm360_vm0, %v4907_v38  ;;  %v1202_v9 = vsel %vm1201_vm5, %v6416_v42, %v6371_v25 }
  0xaf   : > { %v6426_v45 = vpop.permute.xlu1 %1418 }
  0xb1   : > { %4900 = vmatmul.mubr.msk.f32.gmra.mrb[4].mxu0 %vm360_vm0, %v337_v33  ;;  %5263 = vmatmul.mubr.msk.f32.vlgmr.msra.gmra.mrb[0].mxu1 %vm360_vm0, %v4908_v43  ;;  %v6434_v48 = vpop.permute.xlu0 %1416 }
  0xb2   : > { %654 = vmatprep.mubr.f32.mxu0 %v7543_v1  ;;  %5265 = vmatprep.mubr.msk.f32.mxu1 %vm360_vm0, %v4909_v44  ;;  %v1424_v11 = vsel %vm1422_vm6, %v6434_v48, %v6426_v45 }
  0xb3   : > { %5269 = vmatpush3.msk.msra.mxu1 %vm373_vm2, %v983_v35  ;;  %v1421_v53 = vpop.permute.xlu1 %1420 }
  0xb4   : > { %5276 = vmatprep.subr.msk.mxu1 %vm373_vm2, %v1204_v47  ;;  %v1425_v57 = vsel %vm1422_vm6, %v6426_v45, %v1421_v53  ;;  %v2341_v45 = vld [vmem:[%s7521_s3] sm:$0x7] }
  0xb5   : > { %4901 = vmatmul.mubr.msk.f32.gmra.mrb[6].mxu0 %vm360_vm0, %v338_v37  ;;  %5266 = vmatmul.mubr.msk.f32.gmra.mrb[2].mxu1 %vm360_vm0, %v4910_v49  ;;  %v6448_v51 = vpop.permute.xlu0 %1414 }
  0xb6   : > { %845 = vmatprep.mubr.f32.mxu0 %v7543_v1  ;;  %5270 = vmatprep.mubr.msk.f32.mxu1 %vm360_vm0, %v4922_v50  ;;  %v1423_v23 = vsel %vm1422_vm6, %v6448_v51, %v6434_v48 }
  0xb7   : > { %v1642_v59 = vpop.permute.xlu1 %1641 }
  0xb9   : > { %4913 = vmatmul.mubr.msk.f32.vlgmr.msra.gmra.mrb[0].mxu0 %vm360_vm0, %v4907_v38  ;;  %5271 = vmatmul.mubr.msk.f32.vlgmr.msra.gmra.mrb[0].mxu1 %vm360_vm0, %v4923_v52  ;;  %v6476_v60 = vpop.permute.xlu0 %1639 }
  0xba   : > { %4927 = vmatpush1.msk.msra.mxu0 %vm373_vm2, %v981_v54  ;;  %851 = vmatprep.mubr.f32.mxu0 %v7543_v1  ;;  %v1646_v3 = vsel %vm1643_vm7, %v6476_v60, %v1642_v59 }
  0xbb   : > { %5273 = vmatprep.mubr.msk.f32.mxu1 %vm360_vm0, %v6461_v55  ;;  %5277 = vmatpush3.msk.msra.mxu1 %vm373_vm2, %v1204_v47  ;;  %v6504_v0 = vpop.permute.xlu1 %1635 }
  0xbc   : > { %5284 = vmatprep.subr.msk.mxu1 %vm373_vm2, %v1425_v57  ;;  %4941 = vmatprep.subr.msk.mxu0 %vm373_vm2, %v1203_v56 }
  0xbd   : > { %4914 = vmatmul.mubr.msk.f32.gmra.mrb[2].mxu0 %vm360_vm0, %v4908_v43  ;;  %5274 = vmatmul.mubr.msk.f32.gmra.mrb[2].mxu1 %vm360_vm0, %v6474_v58  ;;  %v6506_v2 = vpop.permute.xlu0 %1637 }
  0xbe   : > { %857 = vmatprep.mubr.f32.mxu0 %v7543_v1  ;;  %5278 = vmatprep.mubr.msk.f32.mxu1 %vm360_vm0, %v6484_v61  ;;  %v1645_v25 = vsel %vm1643_vm7, %v6506_v2, %v6476_v60  ;;  %v1644_v32 = vsel %vm1643_vm7, %v6504_v0, %v6506_v2 }
  0xbf   : > { %v1863_v7 = vpop.permute.xlu1 %1862 }
  0xc1   : > { %4915 = vmatmul.mubr.msk.f32.gmra.mrb[4].mxu0 %vm360_vm0, %v4909_v44  ;;  %5279 = vmatmul.mubr.msk.f32.vlgmr.msra.gmra.mrb[0].mxu1 %vm360_vm0, %v6497_v62  ;;  %v6539_v8 = vpop.permute.xlu0 %1860  ;;  %v7533_v44 = vsub.s32 2, %v6717_v41 }
  0xc2   : > { %863 = vmatprep.mubr.f32.mxu0 %v7543_v1  ;;  %5281 = vmatprep.mubr.msk.f32.mxu1 %vm360_vm0, %v6502_v63  ;;  %v1867_v12 = vsel %vm1864_vm8, %v6539_v8, %v1863_v7 }
  0xc3   : > { %5285 = vmatpush3.msk.msra.mxu1 %vm373_vm2, %v1425_v57  ;;  %v2084_v16 = vpop.permute.xlu1 %2083  ;;  %v2354_v48 = vrot.slane %v2341_v45, %v7533_v44 }
  0xc4   : > { %5292 = vmatprep.subr.msk.mxu1 %vm373_vm2, %v1646_v3 }
  0xc5   : > { %4916 = vmatmul.mubr.msk.f32.gmra.mrb[6].mxu0 %vm360_vm0, %v4910_v49  ;;  %5282 = vmatmul.mubr.msk.f32.gmra.mrb[2].mxu1 %vm360_vm0, %v6519_v4  ;;  %v2082_v17 = vpop.permute.xlu0 %2081 }
  0xc6   : > { %1066 = vmatprep.mubr.f32.mxu0 %v7543_v1  ;;  %5286 = vmatprep.mubr.msk.f32.mxu1 %vm360_vm0, %v6525_v5  ;;  %v2088_v19 = vsel %vm2085_vm9, %v2082_v17, %v2084_v16 }
  0xc7   : > { %v1857_v34 = vpop.permute.xlu1 %1856 }
  0xc9   : > { %4928 = vmatmul.mubr.msk.f32.vlgmr.msra.gmra.mrb[0].mxu0 %vm360_vm0, %v4922_v50  ;;  %5287 = vmatmul.mubr.msk.f32.vlgmr.msra.gmra.mrb[0].mxu1 %vm360_vm0, %v6537_v6  ;;  %v1859_v31 = vpop.permute.xlu0 %1858 }
  0xca   : > { %1072 = vmatprep.mubr.f32.mxu0 %v7543_v1  ;;  %4942 = vmatpush1.msk.msra.mxu0 %vm373_vm2, %v1202_v9  ;;  %v1866_v33 = vsel %vm1864_vm8, %v1859_v31, %v6539_v8  ;;  %v1865_v36 = vsel %vm1864_vm8, %v1857_v34, %v1859_v31 }
  0xcb   : > { %5289 = vmatprep.mubr.msk.f32.mxu1 %vm360_vm0, %v6547_v10  ;;  %5293 = vmatpush3.msk.msra.mxu1 %vm373_vm2, %v1646_v3  ;;  %v2078_v38 = vpop.permute.xlu1 %2077  ;;  %v6739_v3 = vld [vmem:[%s7522_s4 + $0x20] sm:$0xff] }
  0xcc   : > { %5300 = vmatprep.subr.msk.mxu1 %vm373_vm2, %v1867_v12  ;;  %4956 = vmatprep.subr.msk.mxu0 %vm373_vm2, %v1424_v11 }
  0xcd   : > { %4929 = vmatmul.mubr.msk.f32.gmra.mrb[2].mxu0 %vm360_vm0, %v4923_v52  ;;  %5290 = vmatmul.mubr.msk.f32.gmra.mrb[2].mxu1 %vm360_vm0, %v6562_v13  ;;  %v2080_v35 = vpop.permute.xlu0 %2079 }
  0xce   : > { %1078 = vmatprep.mubr.f32.mxu0 %v7543_v1  ;;  %5294 = vmatprep.mubr.msk.f32.mxu1 %vm360_vm0, %v6570_v14  ;;  %v2087_v37 = vsel %vm2085_vm9, %v2080_v35, %v2082_v17  ;;  %v2086_v39 = vsel %vm2085_vm9, %v2078_v38, %v2080_v35 }
  0xd1   : > { %4930 = vmatmul.mubr.msk.f32.gmra.mrb[4].mxu0 %vm360_vm0, %v6461_v55  ;;  %5295 = vmatmul.mubr.msk.f32.vlgmr.msra.gmra.mrb[0].mxu1 %vm360_vm0, %v6583_v15 }
  0xd2   : > { %1084 = vmatprep.mubr.f32.mxu0 %v7543_v1  ;;  %5297 = vmatprep.mubr.msk.f32.mxu1 %vm360_vm0, %v6588_v18 }
  0xd3   : > { %5301 = vmatpush3.msk.msra.mxu1 %vm373_vm2, %v1867_v12 }
  0xd4   : > { %5308 = vmatprep.subr.msk.mxu1 %vm373_vm2, %v2088_v19 }
  0xd5   : > { %4931 = vmatmul.mubr.msk.f32.gmra.mrb[6].mxu0 %vm360_vm0, %v6474_v58  ;;  %5298 = vmatmul.mubr.msk.f32.gmra.mrb[2].mxu1 %vm360_vm0, %v4970_v20 }
  0xd6   : > { %1287 = vmatprep.mubr.f32.mxu0 %v7543_v1  ;;  %5302 = vmatprep.mubr.msk.f32.mxu1 %vm360_vm0, %v6605_v21 }
  0xd9   : > { %4943 = vmatmul.mubr.msk.f32.vlgmr.msra.gmra.mrb[0].mxu0 %vm360_vm0, %v6484_v61  ;;  %5303 = vmatmul.mubr.msk.f32.vlgmr.msra.gmra.mrb[0].mxu1 %vm360_vm0, %v4983_v22 }
  0xda   : > { %4957 = vmatpush1.msk.msra.mxu0 %vm373_vm2, %v1423_v23  ;;  %1293 = vmatprep.mubr.f32.mxu0 %v7543_v1 }
  0xdb   : > { %5305 = vmatprep.mubr.msk.f32.mxu1 %vm360_vm0, %v4984_v24  ;;  %5309 = vmatpush3.msk.msra.mxu1 %vm373_vm2, %v2088_v19 }
  0xdc   : > { %4971 = vmatprep.subr.msk.mxu0 %vm373_vm2, %v1645_v25  ;;  %v2305_v43 = vpop.permute.xlu1 %2304 }
  0xdd   : > { %4944 = vmatmul.mubr.msk.f32.gmra.mrb[2].mxu0 %vm360_vm0, %v6497_v62  ;;  %5306 = vmatmul.mubr.msk.f32.gmra.mrb[2].mxu1 %vm360_vm0, %v4985_v26 }
  0xde   : > { %1299 = vmatprep.mubr.f32.mxu0 %v7543_v1  ;;  %5310 = vmatprep.mubr.msk.f32.mxu1 %vm360_vm0, %v4997_v27  ;;  %v2300_v42 = vpop.permute.xlu0 %2299 }
  0xe0   : > { %v2310_v53 = vpop.permute.xlu1 %2309 }
  0xe1   : > { %4945 = vmatmul.mubr.msk.f32.gmra.mrb[4].mxu0 %vm360_vm0, %v6502_v63  ;;  %5311 = vmatmul.mubr.msk.f32.vlgmr.msra.gmra.mrb[0].mxu1 %vm360_vm0, %v4998_v28 }
  0xe2   : > { %1305 = vmatprep.mubr.f32.mxu0 %v7543_v1  ;;  %5313 = vmatprep.mubr.msk.f32.mxu1 %vm360_vm0, %v4999_v29  ;;  %v2315_v51 = vpop.permute.xlu0 %2314 }
  0xe5   : > { %4946 = vmatmul.mubr.msk.f32.gmra.mrb[6].mxu0 %vm360_vm0, %v6519_v4  ;;  %5314 = vmatmul.mubr.msk.f32.gmra.mrb[2].mxu1 %vm360_vm0, %v5000_v30 }
  0xe6   : > { %1508 = vmatprep.mubr.f32.mxu0 %v7543_v1  ;;  %5324 = vmatprep.mubr.msk.f32.mxu1 %vm2435_vm10, %v6739_v3 }
  0xe9   : > { %4958 = vmatmul.mubr.msk.f32.vlgmr.msra.gmra.mrb[0].mxu0 %vm360_vm0, %v6525_v5  ;;  %v7534_v5 = vsub.s32 1, %v6717_v41 }
  0xea   : > { %1514 = vmatprep.mubr.f32.mxu0 %v7543_v1  ;;  %4972 = vmatpush1.msk.msra.mxu0 %vm373_vm2, %v1644_v32 }
  0xeb   : > { %4986 = vmatprep.subr.msk.mxu0 %vm373_vm2, %v1866_v33  ;;  %v2350_v11 = vrot.slane %v2341_v45, %v7534_v5 }
  0xed   : > { %4959 = vmatmul.mubr.msk.f32.gmra.mrb[2].mxu0 %vm360_vm0, %v6537_v6  ;;  %v6752_v6 = vsub.s32 0, %v6717_v41 }
  0xee   : > { %1520 = vmatprep.mubr.f32.mxu0 %v7543_v1 }
  0xf1   : > { %4960 = vmatmul.mubr.msk.f32.gmra.mrb[4].mxu0 %vm360_vm0, %v6547_v10 }
  0xf2   : > { %1526 = vmatprep.mubr.f32.mxu0 %v7543_v1 }
  0xf5   : > { %4961 = vmatmul.mubr.msk.f32.gmra.mrb[6].mxu0 %vm360_vm0, %v6562_v13  ;;  %v2346_v13 = vrot.slane %v2341_v45, %v6752_v6 }
  0xf6   : > { %1729 = vmatprep.mubr.f32.mxu0 %v7543_v1 }
  0xf9   : > { %4973 = vmatmul.mubr.msk.f32.vlgmr.msra.gmra.mrb[0].mxu0 %vm360_vm0, %v6570_v14 }
  0xfa   : > { %4987 = vmatpush1.msk.msra.mxu0 %vm373_vm2, %v1865_v36  ;;  %1735 = vmatprep.mubr.f32.mxu0 %v7543_v1 }
  0xfb   : > { %5001 = vmatprep.subr.msk.mxu0 %vm373_vm2, %v2087_v37 }
  0xfd   : > { %4974 = vmatmul.mubr.msk.f32.gmra.mrb[2].mxu0 %vm360_vm0, %v6583_v15 }
  0xfe   : > { %1741 = vmatprep.mubr.f32.mxu0 %v7543_v1 }
 0x101   : > { %4975 = vmatmul.mubr.msk.f32.gmra.mrb[4].mxu0 %vm360_vm0, %v6588_v18 }
 0x102   : > { %1747 = vmatprep.mubr.f32.mxu0 %v7543_v1 }
 0x105   : > { %4976 = vmatmul.mubr.msk.f32.gmra.mrb[6].mxu0 %vm360_vm0, %v4970_v20 }
 0x106   : > { %1950 = vmatprep.mubr.f32.mxu0 %v7543_v1 }
 0x109   : > { %4988 = vmatmul.mubr.msk.f32.vlgmr.msra.gmra.mrb[0].mxu0 %vm360_vm0, %v6605_v21 }
 0x10a   : > { %1956 = vmatprep.mubr.f32.mxu0 %v7543_v1  ;;  %5002 = vmatpush1.msk.msra.mxu0 %vm373_vm2, %v2086_v39 }
 0x10d   : > { %4989 = vmatmul.mubr.msk.f32.gmra.mrb[2].mxu0 %vm360_vm0, %v4983_v22 }
 0x10e   : > { %1962 = vmatprep.mubr.f32.mxu0 %v7543_v1 }
 0x111   : > { %4990 = vmatmul.mubr.msk.f32.gmra.mrb[4].mxu0 %vm360_vm0, %v4984_v24 }
 0x112   : > { %1968 = vmatprep.mubr.f32.mxu0 %v7543_v1 }
 0x115   : > { %4991 = vmatmul.mubr.msk.f32.gmra.mrb[6].mxu0 %vm360_vm0, %v4985_v26 }
 0x116   : > { %2171 = vmatprep.mubr.f32.mxu0 %v7543_v1 }
 0x119   : > { %5003 = vmatmul.mubr.msk.f32.vlgmr.msra.gmra.mrb[0].mxu0 %vm360_vm0, %v4997_v27 }
 0x11a   : > { %2177 = vmatprep.mubr.f32.mxu0 %v7543_v1 }
 0x11d   : > { %5004 = vmatmul.mubr.msk.f32.gmra.mrb[2].mxu0 %vm360_vm0, %v4998_v28 }
 0x11e   : > { %2183 = vmatprep.mubr.f32.mxu0 %v7543_v1 }
 0x121   : > { %5005 = vmatmul.mubr.msk.f32.gmra.mrb[4].mxu0 %vm360_vm0, %v4999_v29 }
 0x122   : > { %2189 = vmatprep.mubr.f32.mxu0 %v7543_v1 }
 0x125   : > { %5006 = vmatmul.mubr.msk.f32.gmra.mrb[6].mxu0 %vm360_vm0, %v5000_v30 }
 0x126   : > { %2512 = vmatprep.mubr.f32.mxu0 %v7543_v1 }
 0x1b4   : > { %v5312_v46 = vpop.f32.mrb[0].mxu1 }
 0x1b5   : > { %v2322_v47 = vadd.f32 %v5312_v46, %v2305_v43  ;;  %v2262_v49 = vpop.f32.mrb[1].mxu1 }
 0x1b6   : > { %v2319_v50 = vadd.f32 %v2300_v42, %v2262_v49 }
 0x1b7   : > { %v2334_v52 = vmax.f32 %v2322_v47, 0.0 }
 0x1b8   : > { %v2331_v54 = vmax.f32 %v2319_v50, 0.0  ;;  %v5315_v55 = vpop.f32.mrb[2].mxu1 }
 0x1b9   : > { %v6725_v56 = vmul.f32 %v2354_v48, %v2334_v52  ;;  %v2328_v57 = vadd.f32 %v5315_v55, %v2315_v51  ;;  %v2272_v58 = vpop.f32.mrb[3].mxu1 }
 0x1ba   : > { %v6727_v59 = vmul.f32 %v2354_v48, %v2331_v54  ;;  %v2325_v60 = vadd.f32 %v2310_v53, %v2272_v58 }
 0x1bb   : > { %v2340_v61 = vmax.f32 %v2328_v57, 0.0 }
 0x1bc   : > { %v2337_v62 = vmax.f32 %v2325_v60, 0.0  ;;  %v5859_v63 = vpack.i.bf16 %v6725_v56, %v6727_v59 }
 0x1bd   : > { %v6731_v0 = vmul.f32 %v2354_v48, %v2340_v61 }
 0x1be   : > { %v6733_v2 = vmul.f32 %v2354_v48, %v2337_v62  ;;  %5860 = vrot.lane.b32.xlu1 %v5859_v63, %s6166_s29 }
 0x1c0   : > { %v5864_v4 = vpack.i.bf16 %v6731_v0, %v6733_v2 }
 0x1c2   : > { %5870 = vrot.lane.b32.xlu1 %v5859_v63, %s6167_s30  ;;  %5865 = vrot.lane.b32.xlu0 %v5864_v4, %s6166_s29 }
 0x1c6   : > { %5875 = vrot.lane.b32.xlu1 %v5859_v63, %s6168_s10  ;;  %5880 = vrot.lane.b32.xlu0 %v5864_v4, %s6167_s30 }
 0x1ca   : > { %5885 = vrot.lane.b32.xlu0 %v5864_v4, %s6168_s10 }
 0x1ec   : > { %v2173_v7 = vpop.f32.mrb[0].mxu0 }
 0x1ed   : > { %v2317_v8 = vadd.f32 %v2300_v42, %v2173_v7  ;;  %v2175_v9 = vpop.f32.mrb[1].mxu0 }
 0x1ee   : > { %v2318_v10 = vadd.f32 %v2300_v42, %v2175_v9 }
 0x1ef   : > { %v2329_v12 = vmax.f32 %v2317_v8, 0.0  ;;  %v5477_v8 = vpack.c.bf16 %v6725_v56, %v6727_v59 }
 0x1f0   : > { %v2330_v14 = vmax.f32 %v2318_v10, 0.0  ;;  %v2179_v15 = vpop.f32.mrb[2].mxu0  ;;  %v6902_v10 = vld [vmem:[%s7522_s4 + $0x28] sm:$0xff] }
 0x1f1   : > { %v2320_v16 = vadd.f32 %v2305_v43, %v2179_v15  ;;  %v2181_v17 = vpop.f32.mrb[3].mxu0  ;;  %v6759_v20 = vmul.f32 %v2346_v13, %v2329_v12 }
 0x1f2   : > { %v6757_v18 = vmul.f32 %v2350_v11, %v2330_v14  ;;  %v2321_v19 = vadd.f32 %v2305_v43, %v2181_v17  ;;  %v6924_v14 = vld [vmem:[%s7522_s4 + $0x38] sm:$0xff] }
 0x1f3   : > { %v2332_v21 = vmax.f32 %v2320_v16, 0.0  ;;  %v6941_v16 = vld [vmem:[%s7522_s4] sm:$0xff] }
 0x1f4   : > { %v2333_v22 = vmax.f32 %v2321_v19, 0.0  ;;  %v2185_v23 = vpop.f32.mrb[4].mxu0  ;;  %v6763_v24 = vpack.i.bf16 %v6727_v59, %v6757_v18  ;;  %v6915_v59 = vld [vmem:[%s7522_s4 + $0x30] sm:$0xff]  ;;  %v6950_v19 = vld [vmem:[%s7522_s4 + $0x8] sm:$0xff] }
 0x1f5   : > { %v6765_v25 = vmul.f32 %v2346_v13, %v2332_v21  ;;  %v2323_v26 = vadd.f32 %v2310_v53, %v2185_v23  ;;  %v2187_v27 = vpop.f32.mrb[5].mxu0 }
 0x1f6   : > { %v6767_v28 = vmul.f32 %v2350_v11, %v2333_v22  ;;  %v2324_v29 = vadd.f32 %v2310_v53, %v2187_v27  ;;  %5890 = vrot.lane.b32.xlu1 %v6763_v24, %s6169_s15  ;;  %v6976_v27 = vld [vmem:[%s7522_s4 + $0x18] sm:$0xff] }
 0x1f7   : > { %v6773_v30 = vpack.i.bf16 %v6765_v25, %v6759_v20  ;;  %v2335_v35 = vmax.f32 %v2323_v26, 0.0 }
 0x1f8   : > { %v2336_v31 = vmax.f32 %v2324_v29, 0.0  ;;  %v2191_v32 = vpop.f32.mrb[6].mxu0  ;;  %v6777_v33 = vpack.i.bf16 %v6725_v56, %v6767_v28  ;;  %v6781_v34 = vpack.i.bf16 %v6767_v28, %v6757_v18  ;;  %v5481_v56 = vpack.c.bf16 %v6731_v0, %v6733_v2 }
 0x1f9   : > { %v2326_v36 = vadd.f32 %v2315_v51, %v2191_v32  ;;  %v2193_v37 = vpop.f32.mrb[7].mxu0  ;;  %v6793_v46 = vmul.f32 %v2346_v13, %v2335_v35  ;;  %v6993_v32 = vld [vmem:[%s7522_s4 + $0x40] sm:$0xff]  ;;  %v4538_v35 = vld [vmem:[%s7523_s5 + $0x8] sm:$0xff] }
 0x1fa   : > { %v6783_v38 = vmul.f32 %v2350_v11, %v2336_v31  ;;  %v2327_v39 = vadd.f32 %v2315_v51, %v2193_v37  ;;  %5895 = vrot.lane.b32.xlu1 %v6773_v30, %s6169_s15  ;;  %5900 = vrot.lane.b32.xlu0 %v6777_v33, %s6169_s15  ;;  %v7021_v37 = vld [vmem:[%s7522_s4 + $0x50] sm:$0xff] }
 0x1fb   : > { %v2338_v42 = vmax.f32 %v2326_v36, 0.0 }
 0x1fc   : > { %v2339_v43 = vmax.f32 %v2327_v39, 0.0  ;;  %v6791_v45 = vpack.i.bf16 %v6733_v2, %v6783_v38  ;;  %v7026_v39 = vld [vmem:[%s7522_s4 + $0x58] sm:$0xff] }
 0x1fd   : > { %v6795_v47 = vmul.f32 %v2346_v13, %v2338_v42  ;;  %v4539_v42 = vld [vmem:[%s7523_s5 + $0x10] sm:$0xff] }
 0x1fe   : > { %v6797_v48 = vmul.f32 %v2350_v11, %v2339_v43  ;;  %5905 = vrot.lane.b32.xlu0 %v6791_v45, %s6169_s15  ;;  %v4540_v43 = vld [vmem:[%s7523_s5 + $0x18] sm:$0xff] }
 0x1ff   : > { %v6803_v49 = vpack.i.bf16 %v6795_v47, %v6793_v46 }
 0x200   : > { %v6807_v50 = vpack.i.bf16 %v6731_v0, %v6797_v48  ;;  %v6811_v51 = vpack.i.bf16 %v6797_v48, %v6783_v38 }
 0x202   : > { %5910 = vrot.lane.b32.xlu1 %v6807_v50, %s6169_s15  ;;  %5915 = vrot.lane.b32.xlu0 %v6803_v49, %s6169_s15  ;;  %s7550_s15 = smov 87  }
 0x206   : > { %5920 = vrot.lane.b32.xlu1 %v6763_v24, %s6170_s17  ;;  %5925 = vrot.lane.b32.xlu0 %v6777_v33, %s6170_s17 }
 0x20a   : > { %5930 = vrot.lane.b32.xlu1 %v6773_v30, %s6170_s17  ;;  %5935 = vrot.lane.b32.xlu0 %v6791_v45, %s6170_s17 }
 0x20e   : > { %5940 = vrot.lane.b32.xlu1 %v6807_v50, %s6170_s17  ;;  %5945 = vrot.lane.b32.xlu0 %v6803_v49, %s6170_s17  ;;  %s4802_s17 = scalar_lea.sflag [#allocation4], %s325_s24 }
 0x212   : > { %5950 = vrot.lane.b32.xlu1 %v6781_v34, %s6166_s29  ;;  %5955 = vrot.lane.b32.xlu0 %v6763_v24, %s6171_s18 }
 0x216   : > { %5960 = vrot.lane.b32.xlu1 %v6777_v33, %s6171_s18  ;;  %5965 = vrot.lane.b32.xlu0 %v6773_v30, %s6166_s29 }
 0x21a   : > { %5970 = vrot.lane.b32.xlu1 %v6773_v30, %s6171_s18  ;;  %5985 = vrot.lane.b32.xlu0 %v6811_v51, %s6166_s29 }
 0x21e   : > { %5975 = vrot.lane.b32.xlu1 %v6791_v45, %s6171_s18  ;;  %5990 = vrot.lane.b32.xlu0 %v6807_v50, %s6171_s18 }
 0x222   : > { %5980 = vrot.lane.b32.xlu1 %v6803_v49, %s6166_s29  ;;  %5995 = vrot.lane.b32.xlu0 %v6803_v49, %s6171_s18  ;;  %s7551_s18 = smov 86   ;;  %s7476_s29 = scalar_lea.hbm %s7527_s9, %s5804_s23 }
 0x226   : > { %6000 = vrot.lane.b32.xlu1 %v6763_v24, %s7550_s15  ;;  %6005 = vrot.lane.b32.xlu0 %v6777_v33, %s7550_s15 }
 0x22a   : > { %6010 = vrot.lane.b32.xlu1 %v6773_v30, %s7550_s15  ;;  %6015 = vrot.lane.b32.xlu0 %v6791_v45, %s7550_s15 }
 0x22e   : > { %6025 = vrot.lane.b32.xlu1 %v6807_v50, %s7550_s15  ;;  %6020 = vrot.lane.b32.xlu0 %v6803_v49, %s7550_s15  ;;  %s4816_s15 = sshll.u32 %s327_s26, 4  ;;  %s7478_s15 = int_to_ptr.vmem [resolvable:$true] %s4816_s15 }
 0x22f   : > { %p6108_p0 = scmp.lt.s32.totalorder %s7478_s15, %s6106_s22 }
 0x230   : > { %v6869_v57 = vpop.permute.xlu1 %5860 }
 0x231   : > { %v5863_v58 = vunpack.i.h.bf16 %v6869_v57  ;;  %v5862_v60 = vunpack.i.l.bf16 %v6869_v57 }
 0x232   : > { %6030 = vrot.lane.b32.xlu1 %v6781_v34, %s6167_s30  ;;  %6035 = vrot.lane.b32.xlu0 %v6773_v30, %s6167_s30 }
 0x233   : > { %v5461_v61 = vpack.c.bf16 %v5863_v58, %v5862_v60 }
 0x234   : > { %v6881_v62 = vpop.permute.xlu0 %5865  ;;  %v6895_v9 = vpop.permute.xlu1 %5870 }
 0x235   : > { %v7547_v63 = vunpack.i.h.bf16 %v6881_v62  ;;  %v5867_v4 = vunpack.i.l.bf16 %v6881_v62  ;;  %5462 = vmatprep.subr.bf16.mxu1 %v5461_v61  ;;  %v7541_v11 = vunpack.i.h.bf16 %v6895_v9  ;;  %v7542_v12 = vunpack.i.l.bf16 %v6895_v9 }
 0x236   : > { %5464 = vmatpush3.bf16.msra.mxu1 %v5461_v61  ;;  %6045 = vrot.lane.b32.xlu1 %v6811_v51, %s6167_s30  ;;  %v7062_v61 = vld [vmem:[%s7522_s4 + $0x78] sm:$0xff] }
 0x237   : > { %v5465_v7 = vpack.c.bf16 %v7547_v63, %v5867_v4  ;;  %6040 = vrot.lane.b32.xlu0 %v6803_v49, %s6167_s30  ;;  %v5493_v0 = vpack.c.bf16 %v7541_v11, %v7542_v12  ;;  %s6101_s30 = scalar_lea.vmem %s7478_s15, 48 }
 0x238   : > { %v6917_v13 = vpop.permute.xlu0 %5880  ;;  %v6943_v17 = vpop.permute.xlu1 %5875  ;;  %p6102_p11 = scmp.ne.s32.totalorder %s7478_s15, %s6101_s30  ;;  %p6109_p1 = scmp.lt.s32.totalorder %s6107_s27, %s6101_s30 }
 0x239   : > { %5466 = vmatprep.subr.bf16.mxu1 %v5465_v7  ;;  %v7539_v2 = vunpack.i.h.bf16 %v6917_v13  ;;  %v7540_v15 = vunpack.i.l.bf16 %v6917_v13  ;;  %v7537_v21 = vunpack.i.h.bf16 %v6943_v17  ;;  %v7538_v22 = vunpack.i.l.bf16 %v6943_v17 }
 0x23a   : > { %5468 = vmatpush3.bf16.msra.mxu1 %v5465_v7  ;;  %6050 = vrot.lane.b32.xlu1 %v6781_v34, %s6168_s10  ;;  %v4537_v34 = vld [vmem:[%s7523_s5] sm:$0xff]  ;;  %p6103_p12 = pnand %p6102_p11, %p6270_p5  ;;  %p6110_p2 = por %p6109_p1, %p6108_p0 }
 0x23b   : > { %6055 = vrot.lane.b32.xlu0 %v6763_v24, %s7551_s18  ;;  %5478 = vmatprep.subr.bf16.mxu1 %v5477_v8  ;;  %v5497_v23 = vpack.c.bf16 %v7539_v2, %v7540_v15  ;;  %v6967_v24 = vld [vmem:[%s7522_s4 + $0x10] sm:$0xff]  ;;  %v5509_v29 = vpack.c.bf16 %v7537_v21, %v7538_v22 }
 0x23c   : > { %v6969_v26 = vpop.permute.xlu0 %5885  ;;  %p6104_p13 = pneg %p6103_p12 }
 0x23d   : > { %5325 = vmatmul.mubr.msk.f32.vlgmr.msra.gmra.mrb[4].mxu1 %vm2435_vm10, %v6902_v10  ;;  %v7536_v31 = vunpack.i.l.bf16 %v6969_v26 }
 0x23e   : > { %5480 = vmatpush3.bf16.msra.mxu1 %v5477_v8  ;;  %6060 = vrot.lane.b32.xlu1 %v6777_v33, %s7551_s18  ;;  %v7000_v33 = vld [vmem:[%s7522_s4 + $0x48] sm:$0xff]  ;;  %p6111_p3 = pnand %p6110_p2, %p6104_p13 }
 0x23f   : > { %6065 = vrot.lane.b32.xlu0 %v6773_v30, %s6168_s10  ;;  %5482 = vmatprep.subr.bf16.mxu1 %v5481_v56 }
 0x240   : > { %5327 = vmatprep.mubr.msk.f32.mxu1 %vm2435_vm10, %v6915_v59 }
 0x241   : > { %5328 = vmatmul.mubr.msk.f32.gmra.mrb[6].mxu1 %vm2435_vm10, %v6924_v14 }
 0x242   : > { %5484 = vmatpush3.bf16.msra.mxu1 %v5481_v56  ;;  %6070 = vrot.lane.b32.xlu1 %v6773_v30, %s7551_s18  ;;  %v7535_v30 = vunpack.i.h.bf16 %v6969_v26 }
 0x243   : > { %6085 = vrot.lane.b32.xlu0 %v6811_v51, %s6168_s10  ;;  %5494 = vmatprep.subr.bf16.mxu1 %v5493_v0  ;;  %v7053_v51 = vld [vmem:[%s7522_s4 + $0x70] sm:$0xff] }
 0x244   : > { %5338 = vmatprep.mubr.msk.f32.mxu1 %vm2435_vm10, %v6941_v16  ;;  %v5513_v36 = vpack.c.bf16 %v7535_v30, %v7536_v31 }
 0x245   : > { %5339 = vmatmul.mubr.msk.f32.vlgmr.msra.gmra.mrb[4].mxu1 %vm2435_vm10, %v6950_v19 }
 0x246   : > { %5496 = vmatpush3.bf16.msra.mxu1 %v5493_v0  ;;  %6075 = vrot.lane.b32.xlu1 %v6791_v45, %s7551_s18  ;;  %v7039_v45 = vld [vmem:[%s7522_s4 + $0x60] sm:$0xff] }
 0x247   : > { %6090 = vrot.lane.b32.xlu0 %v6807_v50, %s7551_s18  ;;  %5498 = vmatprep.subr.bf16.mxu1 %v5497_v23  ;;  %v4615_v50 = vld [vmem:[#allocation2] sm:$0x1] }
 0x248   : > { %5341 = vmatprep.mubr.msk.f32.mxu1 %vm2435_vm10, %v6967_v24 }
 0x249   : > { %5342 = vmatmul.mubr.msk.f32.gmra.mrb[6].mxu1 %vm2435_vm10, %v6976_v27 }
 0x24a   : > { %5500 = vmatpush3.bf16.msra.mxu1 %v5497_v23  ;;  %6080 = vrot.lane.b32.xlu1 %v6803_v49, %s6168_s10 }
 0x24b   : > { %6095 = vrot.lane.b32.xlu0 %v6803_v49, %s7551_s18  ;;  %5510 = vmatprep.subr.bf16.mxu1 %v5509_v29  ;;  %v7046_v49 = vld [vmem:[%s7522_s4 + $0x68] sm:$0xff] }
 0x24c   : > { %5352 = vmatprep.mubr.msk.f32.mxu1 %vm2435_vm10, %v6993_v32 }
 0x24d   : > { %5353 = vmatmul.mubr.msk.f32.vlgmr.msra.gmra.mrb[4].mxu1 %vm2435_vm10, %v7000_v33 }
 0x24e   : > { %5512 = vmatpush3.bf16.msra.mxu1 %v5509_v29  ;;  %4543 = vperm.xlu1 %5858, %v4537_v34  }
 0x24f   : > { %4548 = vperm.xlu0 %5857, %v4538_v35   ;;  %5514 = vmatprep.subr.bf16.mxu1 %v5513_v36 }
 0x250   : > { %5355 = vmatprep.mubr.msk.f32.mxu1 %vm2435_vm10, %v7021_v37 }
 0x251   : > { %5356 = vmatmul.mubr.msk.f32.gmra.mrb[6].mxu1 %vm2435_vm10, %v7026_v39 }
 0x252   : > { %5516 = vmatpush3.bf16.msra.mxu1 %v5513_v36  ;;  %4553 = vperm.xlu1 %5858, %v4539_v42  }
 0x253   : > { %4558 = vperm.xlu0 %5857, %v4540_v43   ;;  %5366 = vmatprep.mubr.msk.f32.mxu1 %vm2435_vm10, %v7039_v45 }
 0x255   : > { %5367 = vmatmul.mubr.msk.f32.vlgmr.msra.gmra.mrb[4].mxu1 %vm2435_vm10, %v7046_v49 }
 0x256   : > { %4618 = vperm.xlu1 %5858, %v4615_v50   ;;  %5369 = vmatprep.mubr.msk.f32.mxu1 %vm2435_vm10, %v7053_v51 }
 0x259   : > { %5370 = vmatmul.mubr.msk.f32.gmra.mrb[6].mxu1 %vm2435_vm10, %v7062_v61 }
 0x25a   : > { %3427 = vmatprep.mubr.f32.mxu1 %v7543_v1 }
 0x268   : > { %v5891_v7 = vpop.permute.xlu1 %5890 }
 0x269   : > { %v5893_v8 = vunpack.i.h.bf16 %v5891_v7  ;;  %v5892_v56 = vunpack.i.l.bf16 %v5891_v7 }
 0x26b   : > { %v3332_v50 = vsel %vm1201_vm5, %v5892_v56, %v5893_v8 }
 0x26c   : > { %v5896_v0 = vpop.permute.xlu1 %5895  ;;  %v5901_v23 = vpop.permute.xlu0 %5900 }
 0x26d   : > { %v5898_v29 = vunpack.i.h.bf16 %v5896_v0  ;;  %v5897_v34 = vunpack.i.l.bf16 %v5896_v0  ;;  %v5903_v35 = vunpack.i.h.bf16 %v5901_v23  ;;  %v5902_v36 = vunpack.i.l.bf16 %v5901_v23 }
 0x26f   : > { %v3331_v42 = vsel %vm1201_vm5, %v5897_v34, %v5892_v56  ;;  %v3333_v43 = vsel %vm1201_vm5, %v5898_v29, %v5902_v36  ;;  %v3334_v40 = vsel %vm1201_vm5, %v5902_v36, %v5903_v35 }
 0x270   : > { %v5519_v44 = vpack.c.bf16 %v3333_v43, %v3331_v42  ;;  %v5906_v5 = vpop.permute.xlu0 %5905  ;;  %v5517_v30 = vpack.c.bf16 %v3334_v40, %v3332_v50 }
 0x271   : > { %v5908_v31 = vunpack.i.h.bf16 %v5906_v5  ;;  %v5907_v7 = vunpack.i.l.bf16 %v5906_v5  ;;  %v5525_v5 = vpack.c.bf16 %v5903_v35, %v5893_v8  ;;  %v5057_v8 = vld [vmem:[%s7522_s4 + $0x88] sm:$0xff] }
 0x272   : > { %5518 = vmatprep.subr.bf16.mxu1 %v5517_v30 }
 0x273   : > { %5520 = vmatpush1.bf16.msra.mxu1 %v5519_v44  ;;  %v3336_v56 = vsel %vm1201_vm5, %v5907_v7, %v5908_v31 }
 0x274   : > { %v5911_v21 = vpop.permute.xlu1 %5910  ;;  %v5916_v22 = vpop.permute.xlu0 %5915 }
 0x275   : > { %v5913_v0 = vunpack.i.h.bf16 %v5911_v21  ;;  %v5912_v2 = vunpack.i.l.bf16 %v5911_v21  ;;  %v5918_v23 = vunpack.i.h.bf16 %v5916_v22  ;;  %v5917_v15 = vunpack.i.l.bf16 %v5916_v22 }
 0x277   : > { %v3337_v34 = vsel %vm1201_vm5, %v5918_v23, %v5912_v2  ;;  %v3335_v29 = vsel %vm1201_vm5, %v5917_v15, %v5907_v7  ;;  %v3338_v36 = vsel %vm1201_vm5, %v5912_v2, %v5913_v0  ;;  %v5056_v2 = vld [vmem:[%s7522_s4 + $0x80] sm:$0xff]  ;;  %v5529_v23 = vpack.c.bf16 %v5913_v0, %v5908_v31 }
 0x278   : > { %v5523_v42 = vpack.c.bf16 %v3337_v34, %v3335_v29  ;;  %v7075_v40 = vpop.permute.xlu1 %5920  ;;  %v7077_v30 = vpop.permute.xlu0 %5925  ;;  %v5521_v44 = vpack.c.bf16 %v3338_v36, %v3336_v56  ;;  %v5058_v56 = vld [vmem:[%s7522_s4 + $0x90] sm:$0xff] }
 0x279   : > { %v7546_v21 = vunpack.i.h.bf16 %v7075_v40  ;;  %v5922_v22 = vunpack.i.l.bf16 %v7075_v40  ;;  %v7545_v43 = vunpack.i.h.bf16 %v7077_v30  ;;  %v5927_v15 = vunpack.i.l.bf16 %v7077_v30 }
 0x27a   : > { %5522 = vmatprep.subr.bf16.mxu1 %v5521_v44 }
 0x27b   : > { %5524 = vmatpush1.bf16.msra.mxu1 %v5523_v42  ;;  %v3579_v35 = vsel %vm1422_vm6, %v5922_v22, %v7546_v21  ;;  %v3581_v34 = vsel %vm1422_vm6, %v5927_v15, %v7545_v43 }
 0x27c   : > { %v5931_v50 = vpop.permute.xlu1 %5930  ;;  %v7086_v7 = vpop.permute.xlu0 %5935  ;;  %5526 = vmatprep.subr.bf16.mxu1 %v5525_v5  ;;  %v5533_v0 = vpack.c.bf16 %v3581_v34, %v3579_v35 }
 0x27d   : > { %v5933_v11 = vunpack.i.h.bf16 %v5931_v50  ;;  %v5932_v12 = vunpack.i.l.bf16 %v5931_v50  ;;  %v5059_v50 = vld [vmem:[%s7522_s4 + $0x98] sm:$0xff]  ;;  %v5937_v53 = vunpack.i.l.bf16 %v7086_v7 }
 0x27e   : > { %5060 = vmatmul.mubr.msk.f32.vlgmr.msra.gmra.mrb[8].mxu1 %vm2435_vm10, %v5056_v2 }
 0x27f   : > { %5528 = vmatpush3.bf16.msra.mxu1 %v5525_v5  ;;  %3433 = vmatprep.mubr.f32.mxu1 %v7543_v1  ;;  %v3580_v57 = vsel %vm1422_vm6, %v5933_v11, %v5927_v15 }
 0x280   : > { %v7099_v29 = vpop.permute.xlu1 %5940  ;;  %v5946_v31 = vpop.permute.xlu0 %5945  ;;  %5530 = vmatprep.subr.bf16.mxu1 %v5529_v23 }
 0x281   : > { %v5943_v55 = vunpack.i.h.bf16 %v7099_v29  ;;  %v5948_v43 = vunpack.i.h.bf16 %v5946_v31 }
 0x282   : > { %5061 = vmatmul.mubr.msk.f32.gmra.mrb[10].mxu1 %vm2435_vm10, %v5057_v8 }
 0x283   : > { %5532 = vmatpush3.bf16.msra.mxu1 %v5529_v23  ;;  %3439 = vmatprep.mubr.f32.mxu1 %v7543_v1  ;;  %v5942_v23 = vunpack.i.l.bf16 %v7099_v29  ;;  %v5938_v29 = vunpack.i.h.bf16 %v7086_v7 }
 0x284   : > { %v5951_v36 = vpop.permute.xlu1 %5950  ;;  %v7106_v42 = vpop.permute.xlu0 %5955  ;;  %5534 = vmatprep.subr.bf16.mxu1 %v5533_v0 }
 0x285   : > { %v5953_v44 = vunpack.i.h.bf16 %v5951_v36  ;;  %v5952_v5 = vunpack.i.l.bf16 %v5951_v36  ;;  %v3583_v15 = vsel %vm1422_vm6, %v5937_v53, %v5938_v29 }
 0x286   : > { %5062 = vmatmul.mubr.msk.f32.gmra.mrb[12].mxu1 %vm2435_vm10, %v5058_v56 }
 0x287   : > { %3445 = vmatprep.mubr.f32.mxu1 %v7543_v1  ;;  %v2416_v35 = vsel %vm356_vm1, %v5952_v5, %v5862_v60  ;;  %v2418_v34 = vsel %vm356_vm1, %v5953_v44, %v5863_v58  ;;  %v3578_v60 = vsel %vm1422_vm6, %v5932_v12, %v5922_v22  ;;  %v5947_v58 = vunpack.i.l.bf16 %v5946_v31 }
 0x288   : > { %v7121_v0 = vpop.permute.xlu1 %5960  ;;  %v5966_v36 = vpop.permute.xlu0 %5965  ;;  %v5453_v54 = vpack.c.bf16 %v2418_v34, %v2416_v35  ;;  %v3585_v35 = vsel %vm1422_vm6, %v5942_v23, %v5943_v55  ;;  %v5535_v12 = vpack.c.bf16 %v3580_v57, %v3578_v60  ;;  %v7555_v60 = vmov 0.0  }
 0x289   : > { %v5968_v52 = vunpack.i.h.bf16 %v5966_v36  ;;  %v5967_v1 = vunpack.i.l.bf16 %v5966_v36  ;;  %v3582_v31 = vsel %vm1422_vm6, %v5947_v58, %v5937_v53  ;;  %v5957_v58 = vunpack.i.l.bf16 %v7106_v42 }
 0x28a   : > { %5454 = vmatprep.subr.bf16.mxu0 %v5453_v54  ;;  %5063 = vmatmul.mubr.msk.f32.gmra.mrb[14].mxu1 %vm2435_vm10, %v5059_v50  ;;  %v3584_v54 = vsel %vm1422_vm6, %v5948_v43, %v5942_v23  ;;  %v7552_v43 = vunpack.i.h.bf16 %v6881_v62  ;;  %v5962_v23 = vunpack.i.l.bf16 %v7121_v0  ;;  %v5068_v62 = vld [vmem:[%s7522_s4 + $0xa0] sm:$0xff] }
 0x28b   : > { %v2417_v21 = vsel %vm356_vm1, %v5968_v52, %v5953_v44  ;;  %v2415_v63 = vsel %vm356_vm1, %v5967_v1, %v5952_v5  ;;  %5380 = vmatprep.mubr.msk.f32.mxu1 %vm2435_vm10, %v5056_v2  ;;  %v5537_v1 = vpack.c.bf16 %v3585_v35, %v3583_v15  ;;  %v5539_v2 = vpack.c.bf16 %v3584_v54, %v3582_v31  ;;  %v5069_v15 = vld [vmem:[%s7522_s4 + $0xa8] sm:$0xff] }
 0x28c   : > { %v5455_v7 = vpack.c.bf16 %v2417_v21, %v2415_v63  ;;  %v7132_v34 = vpop.permute.xlu1 %5970  ;;  %v5986_v36 = vpop.permute.xlu0 %5985  ;;  %v7554_v44 = vunpack.i.h.bf16 %v7077_v30  ;;  %v5958_v30 = vunpack.i.h.bf16 %v7106_v42 }
 0x28d   : > { %v5988_v22 = vunpack.i.h.bf16 %v5986_v36  ;;  %v5987_v11 = vunpack.i.l.bf16 %v5986_v36 }
 0x28e   : > { %5456 = vmatpush1.bf16.msra.mxu0 %v5455_v7  ;;  %5381 = vmatmul.mubr.msk.f32.vlgmr.msra.gmra.mrb[4].mxu1 %vm2435_vm10, %v5057_v8  ;;  %v7553_v8 = vunpack.i.h.bf16 %v7075_v40  ;;  %v5545_v7 = vpack.c.bf16 %v5943_v55, %v5938_v29  ;;  %v3826_v29 = vsel %vm1643_vm7, %v5957_v58, %v5958_v30 }
 0x28f   : > { %5536 = vmatpush1.bf16.msra.mxu1 %v5535_v12  ;;  %5383 = vmatprep.mubr.msk.f32.mxu1 %vm2435_vm10, %v5058_v56  ;;  %v2420_v52 = vsel %vm356_vm1, %v5987_v11, %v5867_v4  ;;  %v2422_v53 = vsel %vm356_vm1, %v5988_v22, %v7552_v43  ;;  %v5963_v4 = vunpack.i.h.bf16 %v7121_v0 }
 0x290   : > { %5538 = vmatprep.subr.bf16.mxu1 %v5537_v1  ;;  %v7142_v63 = vpop.permute.xlu1 %5975  ;;  %v7144_v21 = vpop.permute.xlu0 %5990  ;;  %v5541_v5 = vpack.c.bf16 %v7554_v44, %v7553_v8  ;;  %v5457_v56 = vpack.c.bf16 %v2422_v53, %v2420_v52  ;;  %v5070_v52 = vld [vmem:[%s7522_s4 + $0xb0] sm:$0xff]  ;;  %v5972_v8 = vunpack.i.l.bf16 %v7132_v34 }
 0x291   : > { %v3828_v54 = vsel %vm1643_vm7, %v5962_v23, %v5963_v4  ;;  %v5977_v44 = vunpack.i.l.bf16 %v7142_v63 }
 0x292   : > { %5384 = vmatmul.mubr.msk.f32.gmra.mrb[6].mxu1 %vm2435_vm10, %v5059_v50  ;;  %5458 = vmatprep.subr.bf16.mxu0 %v5457_v56  ;;  %v5992_v56 = vunpack.i.l.bf16 %v7144_v21 }
 0x293   : > { %5540 = vmatpush1.bf16.msra.mxu1 %v5539_v2  ;;  %3674 = vmatprep.mubr.f32.mxu1 %v7555_v60  ;;  %v5973_v2 = vunpack.i.h.bf16 %v7132_v34  ;;  %v7558_v34 = vpack.c.bf16 %v6797_v48, %v6783_v38  ;;  %v7559_v38 = vpack.c.bf16 %v6795_v47, %v6793_v46 }
 0x294   : > { %5542 = vmatprep.subr.bf16.mxu1 %v5541_v5  ;;  %v5981_v40 = vpop.permute.xlu1 %5980  ;;  %v5996_v57 = vpop.permute.xlu0 %5995 }
 0x295   : > { %v5983_v50 = vunpack.i.h.bf16 %v5981_v40  ;;  %v5982_v35 = vunpack.i.l.bf16 %v5981_v40 }
 0x296   : > { %5072 = vmatmul.mubr.msk.f32.vlgmr.msra.gmra.mrb[8].mxu1 %vm2435_vm10, %v5068_v62 }
 0x297   : > { %v2419_v36 = vsel %vm356_vm1, %v5982_v35, %v5987_v11  ;;  %v2421_v12 = vsel %vm356_vm1, %v5983_v50, %v5988_v22  ;;  %5544 = vmatpush3.bf16.msra.mxu1 %v5541_v5  ;;  %3680 = vmatprep.mubr.f32.mxu1 %v7555_v60  ;;  %v5549_v22 = vpack.c.bf16 %v3828_v54, %v3826_v29  ;;  %v5993_v5 = vunpack.i.h.bf16 %v7144_v21 }
 0x298   : > { %v5459_v31 = vpack.c.bf16 %v2421_v12, %v2419_v36  ;;  %5546 = vmatprep.subr.bf16.mxu1 %v5545_v7  ;;  %v7171_v1 = vpop.permute.xlu1 %6000  ;;  %v7173_v55 = vpop.permute.xlu0 %6005  ;;  %v7556_v11 = vpack.c.bf16 %v6767_v28, %v6757_v18  ;;  %v7557_v18 = vpack.c.bf16 %v6765_v25, %v6759_v20  ;;  %v5978_v28 = vunpack.i.h.bf16 %v7142_v63 }
 0x299   : > { %v5998_v20 = vunpack.i.h.bf16 %v5996_v57  ;;  %v5997_v25 = vunpack.i.l.bf16 %v5996_v57  ;;  %v3825_v35 = vsel %vm1643_vm7, %v5972_v8, %v5957_v58  ;;  %v7560_v29 = vunpack.i.l.bf16 %v6895_v9 }
 0x29a   : > { %5460 = vmatpush1.bf16.msra.mxu0 %v5459_v31  ;;  %5073 = vmatmul.mubr.msk.f32.gmra.mrb[10].mxu1 %vm2435_vm10, %v5069_v15  ;;  %v3830_v48 = vsel %vm1643_vm7, %v5977_v44, %v5978_v28  ;;  %v7561_v8 = vunpack.i.h.bf16 %v6895_v9  ;;  %v6003_v0 = vunpack.i.h.bf16 %v7171_v1  ;;  %v6008_v9 = vunpack.i.h.bf16 %v7173_v55 }
 0x29b   : > { %5548 = vmatpush3.bf16.msra.mxu1 %v5545_v7  ;;  %5470 = vmatprep.subr.bf16.mxu0 %v7556_v11  ;;  %v3827_v7 = vsel %vm1643_vm7, %v5973_v2, %v5962_v23  ;;  %v3832_v23 = vsel %vm1643_vm7, %v5992_v56, %v5993_v5  ;;  %v3831_v46 = vsel %vm1643_vm7, %v5998_v20, %v5992_v56  ;;  %v7565_v63 = vunpack.i.h.bf16 %v6943_v17 }
 0x29c   : > { %5550 = vmatprep.subr.bf16.mxu1 %v5549_v22  ;;  %v7186_v43 = vpop.permute.xlu1 %6010  ;;  %v7188_v53 = vpop.permute.xlu0 %6015  ;;  %3686 = vmatprep.mubr.f32.mxu1 %v7555_v60  ;;  %v5551_v57 = vpack.c.bf16 %v3827_v7, %v3825_v35  ;;  %v5557_v11 = vpack.c.bf16 %v5963_v4, %v5958_v30  ;;  %v6002_v4 = vunpack.i.l.bf16 %v7171_v1  ;;  %v7562_v35 = vunpack.i.l.bf16 %v6917_v13 }
 0x29d   : > { %5016 = vmatmul.mubr.msk.f32.vlgmr.msra.gmra.mrb[8].mxu0 %vm2435_vm10, %v6739_v3  ;;  %v5071_v3 = vld [vmem:[%s7522_s4 + $0xb8] sm:$0xff]  ;;  %v7563_v7 = vunpack.i.h.bf16 %v6917_v13 }
 0x29e   : > { %5472 = vmatpush1.bf16.msra.mxu0 %v7557_v18  ;;  %5074 = vmatmul.mubr.msk.f32.gmra.mrb[12].mxu1 %vm2435_vm10, %v5070_v52 }
 0x29f   : > { %5474 = vmatprep.subr.bf16.mxu0 %v7558_v34  ;;  %2518 = vmatprep.mubr.f32.mxu0 %v7555_v60 }
 0x2a0   : > { %v7210_v40 = vpop.permute.xlu1 %6025  ;;  %v7212_v50 = vpop.permute.xlu0 %6020  ;;  %3692 = vmatprep.mubr.f32.mxu1 %v7555_v60 }
 0x2a1   : > { %5017 = vmatmul.mubr.msk.f32.gmra.mrb[10].mxu0 %vm2435_vm10, %v6902_v10  ;;  %v3829_v10 = vsel %vm1643_vm7, %v5997_v25, %v5977_v44  ;;  %v6007_v25 = vunpack.i.l.bf16 %v7173_v55 }
 0x2a2   : > { %5476 = vmatpush1.bf16.msra.mxu0 %v7559_v38  ;;  %5075 = vmatmul.mubr.msk.f32.gmra.mrb[14].mxu1 %vm2435_vm10, %v5071_v3  ;;  %v5555_v2 = vpack.c.bf16 %v3831_v46, %v3829_v10 }
 0x2a3   : > { %2524 = vmatprep.mubr.f32.mxu0 %v7555_v60  ;;  %5394 = vmatprep.mubr.msk.f32.mxu1 %vm2435_vm10, %v5068_v62  ;;  %v5553_v62 = vpack.c.bf16 %v3832_v23, %v3830_v48 }
 0x2a4   : > { %v6031_v47 = vpop.permute.xlu1 %6030  ;;  %v6036_v58 = vpop.permute.xlu0 %6035 }
 0x2a5   : > { %v6033_v36 = vunpack.i.h.bf16 %v6031_v47  ;;  %v6032_v12 = vunpack.i.l.bf16 %v6031_v47  ;;  %v6038_v54 = vunpack.i.h.bf16 %v6036_v58  ;;  %v6037_v31 = vunpack.i.l.bf16 %v6036_v58  ;;  %5018 = vmatmul.mubr.msk.f32.gmra.mrb[12].mxu0 %vm2435_vm10, %v6915_v59 }
 0x2a6   : > { %5395 = vmatmul.mubr.msk.f32.vlgmr.msra.gmra.mrb[4].mxu1 %vm2435_vm10, %v5069_v15  ;;  %2530 = vmatprep.mubr.f32.mxu0 %v7555_v60 }
 0x2a7   : > { %5552 = vmatpush1.bf16.msra.mxu1 %v5551_v57  ;;  %5397 = vmatprep.mubr.msk.f32.mxu1 %vm2435_vm10, %v5070_v52  ;;  %v2838_v22 = vsel %vm759_vm3, %v6032_v12, %v7560_v29  ;;  %v2839_v59 = vsel %vm759_vm3, %v6038_v54, %v6033_v36  ;;  %v2840_v18 = vsel %vm759_vm3, %v6033_v36, %v7561_v8  ;;  %v7564_v54 = vunpack.i.l.bf16 %v6943_v17 }
 0x2a8   : > { %5554 = vmatprep.subr.bf16.mxu1 %v5553_v62  ;;  %v6046_v15 = vpop.permute.xlu1 %6045  ;;  %v2837_v52 = vsel %vm759_vm3, %v6037_v31, %v6032_v12  ;;  %v5485_v42 = vpack.c.bf16 %v2840_v18, %v2838_v22  ;;  %v5561_v36 = vpack.c.bf16 %v5993_v5, %v5978_v28  ;;  %v4073_v12 = vsel %vm1864_vm8, %v6002_v4, %v6003_v0  ;;  %v5081_v28 = vld [vmem:[%s7522_s4 + $0xc8] sm:$0xff] }
 0x2a9   : > { %v6048_v44 = vunpack.i.h.bf16 %v6046_v15  ;;  %v6047_v56 = vunpack.i.l.bf16 %v6046_v15  ;;  %v6041_v34 = vpop.permute.xlu0 %6040  ;;  %5019 = vmatmul.mubr.msk.f32.gmra.mrb[14].mxu0 %vm2435_vm10, %v6924_v14  ;;  %v5487_v48 = vpack.c.bf16 %v2839_v59, %v2837_v52  ;;  %v4075_v5 = vsel %vm1864_vm8, %v6007_v25, %v6008_v9 }
 0x2aa   : > { %v6043_v30 = vunpack.i.h.bf16 %v6041_v34  ;;  %v6042_v20 = vunpack.i.l.bf16 %v6041_v34  ;;  %5398 = vmatmul.mubr.msk.f32.gmra.mrb[6].mxu1 %vm2435_vm10, %v5071_v3  ;;  %2698 = vmatprep.mubr.f32.mxu0 %v7555_v60  ;;  %v7267_v3 = vld [vmem:[%s7522_s4 + $0xc0] sm:$0xff]  ;;  %v5565_v22 = vpack.c.bf16 %v4075_v5, %v4073_v12  ;;  %v6013_v59 = vunpack.i.h.bf16 %v7186_v43 }
 0x2ab   : > { %5486 = vmatprep.subr.bf16.mxu0 %v5485_v42  ;;  %5556 = vmatpush1.bf16.msra.mxu1 %v5555_v2  ;;  %v2842_v14 = vsel %vm759_vm3, %v6047_v56, %v7562_v35  ;;  %v2844_v38 = vsel %vm759_vm3, %v6048_v44, %v7563_v7  ;;  %v6027_v34 = vunpack.i.l.bf16 %v7210_v40  ;;  %v6017_v42 = vunpack.i.l.bf16 %v7188_v53 }
 0x2ac   : > { %5558 = vmatprep.subr.bf16.mxu1 %v5557_v11  ;;  %v6051_v23 = vpop.permute.xlu1 %6050  ;;  %3921 = vmatprep.mubr.f32.mxu1 %v7555_v60  ;;  %v5489_v57 = vpack.c.bf16 %v2844_v38, %v2842_v14  ;;  %v2843_v10 = vsel %vm759_vm3, %v6043_v30, %v6048_v44  ;;  %v2841_v46 = vsel %vm759_vm3, %v6042_v20, %v6047_v56  ;;  %v6028_v56 = vunpack.i.h.bf16 %v7210_v40 }
 0x2ad   : > { %v6053_v47 = vunpack.i.h.bf16 %v6051_v23  ;;  %v6052_v58 = vunpack.i.l.bf16 %v6051_v23  ;;  %v7272_v13 = vpop.permute.xlu0 %6055  ;;  %5024 = vmatmul.mubr.msk.f32.vlgmr.msra.gmra.mrb[8].mxu0 %vm2435_vm10, %v6941_v16  ;;  %v5491_v31 = vpack.c.bf16 %v2843_v10, %v2841_v46  ;;  %v4074_v40 = vsel %vm1864_vm8, %v6013_v59, %v6007_v25 }
 0x2ae   : > { %5488 = vmatpush1.bf16.msra.mxu0 %v5487_v48  ;;  %5084 = vmatmul.mubr.msk.f32.vlgmr.msra.gmra.mrb[8].mxu1 %vm2435_vm10, %v7267_v3  ;;  %v6023_v7 = vunpack.i.h.bf16 %v7212_v50  ;;  %v7567_v25 = vunpack.i.h.bf16 %v6969_v26  ;;  %v6058_v1 = vunpack.i.h.bf16 %v7272_v13  ;;  %v6057_v55 = vunpack.i.l.bf16 %v7272_v13 }
 0x2af   : > { %5490 = vmatprep.subr.bf16.mxu0 %v5489_v57  ;;  %5560 = vmatpush3.bf16.msra.mxu1 %v5557_v11  ;;  %v3085_v16 = vsel %vm980_vm4, %v6052_v58, %v7564_v54  ;;  %v3087_v21 = vsel %vm980_vm4, %v6053_v47, %v7565_v63  ;;  %v5082_v11 = vld [vmem:[%s7522_s4 + $0xd0] sm:$0xff]  ;;  %v5573_v63 = vpack.c.bf16 %v6008_v9, %v6003_v0  ;;  %v5093_v9 = vld [vmem:[%s7522_s4 + $0xe8] sm:$0xff] }
 0x2b0   : > { %5562 = vmatprep.subr.bf16.mxu1 %v5561_v36  ;;  %v7301_v62 = vpop.permute.xlu1 %6060  ;;  %2704 = vmatprep.mubr.f32.mxu0 %v7555_v60  ;;  %v5501_v29 = vpack.c.bf16 %v3087_v21, %v3085_v16 }
 0x2b1   : > { %v6066_v17 = vpop.permute.xlu0 %6065  ;;  %5025 = vmatmul.mubr.msk.f32.gmra.mrb[10].mxu0 %vm2435_vm10, %v6950_v19  ;;  %3927 = vmatprep.mubr.f32.mxu1 %v7555_v60  ;;  %v6012_v19 = vunpack.i.l.bf16 %v7186_v43  ;;  %v5083_v43 = vld [vmem:[%s7522_s4 + $0xd8] sm:$0xff]  ;;  %v6063_v21 = vunpack.i.h.bf16 %v7301_v62 }
 0x2b2   : > { %5492 = vmatpush1.bf16.msra.mxu0 %v5491_v31  ;;  %5085 = vmatmul.mubr.msk.f32.gmra.mrb[10].mxu1 %vm2435_vm10, %v5081_v28  ;;  %v6068_v15 = vunpack.i.h.bf16 %v6066_v17  ;;  %v6067_v8 = vunpack.i.l.bf16 %v6066_v17 }
 0x2b3   : > { %5502 = vmatprep.subr.bf16.mxu0 %v5501_v29  ;;  %5564 = vmatpush3.bf16.msra.mxu1 %v5561_v36  ;;  %v4072_v20 = vsel %vm1864_vm8, %v6012_v19, %v6002_v4  ;;  %v7566_v4 = vunpack.i.l.bf16 %v6969_v26  ;;  %v4078_v26 = vsel %vm1864_vm8, %v6023_v7, %v6027_v34 }
 0x2b4   : > { %5566 = vmatprep.subr.bf16.mxu1 %v5565_v22  ;;  %v7311_v2 = vpop.permute.xlu1 %6070  ;;  %2710 = vmatprep.mubr.f32.mxu0 %v7555_v60  ;;  %v3086_v35 = vsel %vm980_vm4, %v6068_v15, %v6053_v47  ;;  %v3084_v14 = vsel %vm980_vm4, %v6067_v8, %v6052_v58  ;;  %v5567_v10 = vpack.c.bf16 %v4074_v40, %v4072_v20  ;;  %v5106_v20 = vld [vmem:[%s7522_s4 + $0x110] sm:$0xff]  ;;  %v5107_v40 = vld [vmem:[%s7522_s4 + $0x118] sm:$0xff] }
 0x2b5   : > { %v6086_v18 = vpop.permute.xlu0 %6085  ;;  %5026 = vmatmul.mubr.msk.f32.gmra.mrb[12].mxu0 %vm2435_vm10, %v6967_v24  ;;  %3933 = vmatprep.mubr.f32.mxu1 %v7555_v60  ;;  %v6018_v24 = vunpack.i.h.bf16 %v7188_v53  ;;  %v6022_v53 = vunpack.i.l.bf16 %v7212_v50  ;;  %v5503_v23 = vpack.c.bf16 %v3086_v35, %v3084_v14  ;;  %v6072_v29 = vunpack.i.l.bf16 %v7311_v2 }
 0x2b6   : > { %v6088_v52 = vunpack.i.h.bf16 %v6086_v18  ;;  %v6087_v44 = vunpack.i.l.bf16 %v6086_v18  ;;  %5086 = vmatmul.mubr.msk.f32.gmra.mrb[12].mxu1 %vm2435_vm10, %v5082_v11  ;;  %2716 = vmatprep.mubr.f32.mxu0 %v7555_v60 }
 0x2b7   : > { %3939 = vmatprep.mubr.f32.mxu1 %v7555_v60  ;;  %v4077_v50 = vsel %vm1864_vm8, %v6017_v42, %v6018_v24  ;;  %v4076_v36 = vsel %vm1864_vm8, %v6022_v53, %v6017_v42  ;;  %v5577_v0 = vpack.c.bf16 %v6028_v56, %v6018_v24  ;;  %v5589_v42 = vpack.c.bf16 %v6063_v21, %v6058_v1 }
 0x2b8   : > { %v7329_v30 = vpop.permute.xlu1 %6075  ;;  %v3089_v38 = vsel %vm980_vm4, %v6087_v44, %v7566_v4  ;;  %v3091_v48 = vsel %vm980_vm4, %v6088_v52, %v7567_v25 }
 0x2b9   : > { %5027 = vmatmul.mubr.msk.f32.gmra.mrb[14].mxu0 %vm2435_vm10, %v6976_v27  ;;  %v4079_v27 = vsel %vm1864_vm8, %v6027_v34, %v6028_v56  ;;  %v5505_v58 = vpack.c.bf16 %v3091_v48, %v3089_v38  ;;  %v6091_v31 = vpop.permute.xlu0 %6090  ;;  %v6078_v17 = vunpack.i.h.bf16 %v7329_v30  ;;  %v6077_v22 = vunpack.i.l.bf16 %v7329_v30 }
 0x2ba   : > { %5087 = vmatmul.mubr.msk.f32.gmra.mrb[14].mxu1 %vm2435_vm10, %v5083_v43  ;;  %2933 = vmatprep.mubr.f32.mxu0 %v7555_v60  ;;  %v6092_v59 = vunpack.i.l.bf16 %v6091_v31 }
 0x2bb   : > { %5408 = vmatprep.mubr.msk.f32.mxu1 %vm2435_vm10, %v7267_v3  ;;  %v5569_v3 = vpack.c.bf16 %v4079_v27, %v4077_v50 }
 0x2bc   : > { %v6081_v57 = vpop.permute.xlu1 %6080 }
 0x2bd   : > { %v6083_v46 = vunpack.i.h.bf16 %v6081_v57  ;;  %v6082_v47 = vunpack.i.l.bf16 %v6081_v57  ;;  %5036 = vmatmul.mubr.msk.f32.vlgmr.msra.gmra.mrb[8].mxu0 %vm2435_vm10, %v6993_v32  ;;  %v5571_v32 = vpack.c.bf16 %v4078_v26, %v4076_v36  ;;  %v6096_v19 = vpop.permute.xlu0 %6095 }
 0x2be   : > { %5504 = vmatpush1.bf16.msra.mxu0 %v5503_v23  ;;  %5409 = vmatmul.mubr.msk.f32.vlgmr.msra.gmra.mrb[4].mxu1 %vm2435_vm10, %v5081_v28  ;;  %v6062_v28 = vunpack.i.l.bf16 %v7301_v62  ;;  %v5094_v62 = vld [vmem:[%s7522_s4 + $0xf0] sm:$0xff]  ;;  %v6098_v8 = vunpack.i.h.bf16 %v6096_v19  ;;  %v6097_v18 = vunpack.i.l.bf16 %v6096_v19 }
 0x2bf   : > { %v3088_v12 = vsel %vm980_vm4, %v6082_v47, %v6087_v44  ;;  %v3090_v54 = vsel %vm980_vm4, %v6083_v46, %v6088_v52  ;;  %5506 = vmatprep.subr.bf16.mxu0 %v5505_v58  ;;  %5568 = vmatpush1.bf16.msra.mxu1 %v5567_v10  ;;  %v4324_v52 = vsel %vm2085_vm9, %v6077_v22, %v6078_v17  ;;  %v4585_v47 = vld [vmem:[%s7524_s6] sm:$0x7] }
 0x2c0   : > { %v5507_v16 = vpack.c.bf16 %v3090_v54, %v3088_v12  ;;  %5570 = vmatprep.subr.bf16.mxu1 %v5569_v3  ;;  %2939 = vmatprep.mubr.f32.mxu0 %v7555_v60  ;;  %v4322_v5 = vsel %vm2085_vm9, %v6062_v28, %v6063_v21  ;;  %v4325_v34 = vsel %vm2085_vm9, %v6098_v8, %v6092_v59 }
 0x2c1   : > { %5037 = vmatmul.mubr.msk.f32.gmra.mrb[10].mxu0 %vm2435_vm10, %v7000_v33  ;;  %5411 = vmatprep.mubr.msk.f32.mxu1 %vm2435_vm10, %v5082_v11  ;;  %v5092_v33 = vld [vmem:[%s7522_s4 + $0xe0] sm:$0xff]  ;;  %v6093_v11 = vunpack.i.h.bf16 %v6091_v31 }
 0x2c2   : > { %5508 = vmatpush1.bf16.msra.mxu0 %v5507_v16  ;;  %5412 = vmatmul.mubr.msk.f32.gmra.mrb[6].mxu1 %vm2435_vm10, %v5083_v43 }
 0x2c3   : > { %5572 = vmatpush1.bf16.msra.mxu1 %v5571_v32  ;;  %2945 = vmatprep.mubr.f32.mxu0 %v7555_v60  ;;  %v4326_v44 = vsel %vm2085_vm9, %v6092_v59, %v6093_v11  ;;  %v5593_v30 = vpack.c.bf16 %v6093_v11, %v6078_v17  ;;  %v4590_v32 = vrot.slane %v4585_v47, %v6752_v6 }
 0x2c4   : > { %5574 = vmatprep.subr.bf16.mxu1 %v5573_v63  ;;  %4168 = vmatprep.mubr.f32.mxu1 %v7555_v60  ;;  %v5585_v43 = vpack.c.bf16 %v4326_v44, %v4324_v52 }
 0x2c5   : > { %5038 = vmatmul.mubr.msk.f32.gmra.mrb[12].mxu0 %vm2435_vm10, %v7021_v37  ;;  %v4320_v37 = vsel %vm2085_vm9, %v6057_v55, %v6058_v1 }
 0x2c6   : > { %5096 = vmatmul.mubr.msk.f32.vlgmr.msra.gmra.mrb[8].mxu1 %vm2435_vm10, %v5092_v33  ;;  %2951 = vmatprep.mubr.f32.mxu0 %v7555_v60  ;;  %v5581_v13 = vpack.c.bf16 %v4322_v5, %v4320_v37 }
 0x2c7   : > { %5576 = vmatpush3.bf16.msra.mxu1 %v5573_v63  ;;  %4174 = vmatprep.mubr.f32.mxu1 %v7555_v60 }
 0x2c8   : > { %5578 = vmatprep.subr.bf16.mxu1 %v5577_v0 }
 0x2c9   : > { %5039 = vmatmul.mubr.msk.f32.gmra.mrb[14].mxu0 %vm2435_vm10, %v7026_v39  ;;  %v6073_v39 = vunpack.i.h.bf16 %v7311_v2  ;;  %v4319_v2 = vsel %vm2085_vm9, %v6072_v29, %v6057_v55 }
 0x2ca   : > { %5097 = vmatmul.mubr.msk.f32.gmra.mrb[10].mxu1 %vm2435_vm10, %v5093_v9  ;;  %3180 = vmatprep.mubr.f32.mxu0 %v7555_v60 }
 0x2cb   : > { %5580 = vmatpush3.bf16.msra.mxu1 %v5577_v0  ;;  %4180 = vmatprep.mubr.f32.mxu1 %v7555_v60  ;;  %v4321_v15 = vsel %vm2085_vm9, %v6073_v39, %v6062_v28  ;;  %v7568_v28 = vsub.s32 1, %v6717_v41 }
 0x2cc   : > { %5582 = vmatprep.subr.bf16.mxu1 %v5581_v13  ;;  %v5583_v56 = vpack.c.bf16 %v4321_v15, %v4319_v2 }
 0x2cd   : > { %5048 = vmatmul.mubr.msk.f32.vlgmr.msra.gmra.mrb[8].mxu0 %vm2435_vm10, %v7039_v45  ;;  %v5095_v45 = vld [vmem:[%s7522_s4 + $0xf8] sm:$0xff]  ;;  %v4544_v50 = vpop.permute.xlu1 %4543 }
 0x2ce   : > { %5098 = vmatmul.mubr.msk.f32.gmra.mrb[12].mxu1 %vm2435_vm10, %v5094_v62  ;;  %3186 = vmatprep.mubr.f32.mxu0 %v7555_v60  ;;  %v4549_v12 = vpop.permute.xlu0 %4548 }
 0x2cf   : > { %4186 = vmatprep.mubr.f32.mxu1 %v7555_v60 }
 0x2d1   : > { %5049 = vmatmul.mubr.msk.f32.gmra.mrb[10].mxu0 %vm2435_vm10, %v7046_v49  ;;  %v4323_v49 = vsel %vm2085_vm9, %v6097_v18, %v6077_v22  ;;  %v4554_v31 = vpop.permute.xlu1 %4553 }
 0x2d2   : > { %5099 = vmatmul.mubr.msk.f32.gmra.mrb[14].mxu1 %vm2435_vm10, %v5095_v45  ;;  %3192 = vmatprep.mubr.f32.mxu0 %v7555_v60  ;;  %v5587_v24 = vpack.c.bf16 %v4325_v34, %v4323_v49  ;;  %v4559_v15 = vpop.permute.xlu0 %4558 }
 0x2d3   : > { %5422 = vmatprep.mubr.msk.f32.mxu1 %vm2435_vm10, %v5092_v33  ;;  %v4594_v33 = vrot.slane %v4585_v47, %v7568_v28 }
 0x2d5   : > { %5050 = vmatmul.mubr.msk.f32.gmra.mrb[12].mxu0 %vm2435_vm10, %v7053_v51  ;;  %v5104_v51 = vld [vmem:[%s7522_s4 + $0x100] sm:$0xff] }
 0x2d6   : > { %5423 = vmatmul.mubr.msk.f32.vlgmr.msra.gmra.mrb[4].mxu1 %vm2435_vm10, %v5093_v9  ;;  %3198 = vmatprep.mubr.f32.mxu0 %v7555_v60 }
 0x2d7   : > { %5584 = vmatpush1.bf16.msra.mxu1 %v5583_v56  ;;  %5425 = vmatprep.mubr.msk.f32.mxu1 %vm2435_vm10, %v5094_v62 }
 0x2d8   : > { %5586 = vmatprep.subr.bf16.mxu1 %v5585_v43 }
 0x2d9   : > { %5051 = vmatmul.mubr.msk.f32.gmra.mrb[14].mxu0 %vm2435_vm10, %v7062_v61  ;;  %v5105_v61 = vld [vmem:[%s7522_s4 + $0x108] sm:$0xff] }
 0x2da   : > { %5426 = vmatmul.mubr.msk.f32.gmra.mrb[6].mxu1 %vm2435_vm10, %v5095_v45  ;;  %4692 = vmatprep.mubr.f32.mxu0 %v7555_v60 }
 0x2db   : > { %5588 = vmatpush1.bf16.msra.mxu1 %v5587_v24  ;;  %4415 = vmatprep.mubr.f32.mxu1 %v7555_v60 }
 0x2dc   : > { %5590 = vmatprep.subr.bf16.mxu1 %v5589_v42 }
 0x2de   : > { %5108 = vmatmul.mubr.msk.f32.vlgmr.msra.gmra.mrb[8].mxu1 %vm2435_vm10, %v5104_v51 }
 0x2df   : > { %5592 = vmatpush3.bf16.msra.mxu1 %v5589_v42  ;;  %4421 = vmatprep.mubr.f32.mxu1 %v7555_v60  ;;  %v7569_v42 = vsub.s32 2, %v6717_v41 }
 0x2e0   : > { %5594 = vmatprep.subr.bf16.mxu1 %v5593_v30 }
 0x2e2   : > { %5109 = vmatmul.mubr.msk.f32.gmra.mrb[10].mxu1 %vm2435_vm10, %v5105_v61 }
 0x2e3   : > { %5596 = vmatpush3.bf16.msra.mxu1 %v5593_v30  ;;  %4427 = vmatprep.mubr.f32.mxu1 %v7555_v60 }
 0x2e6   : > { %5110 = vmatmul.mubr.msk.f32.gmra.mrb[12].mxu1 %vm2435_vm10, %v5106_v20 }
 0x2e7   : > { %4433 = vmatprep.mubr.f32.mxu1 %v7555_v60 }
 0x2ea   : > { %5111 = vmatmul.mubr.msk.f32.gmra.mrb[14].mxu1 %vm2435_vm10, %v5107_v40 }
 0x2eb   : > { %5436 = vmatprep.mubr.msk.f32.mxu1 %vm2435_vm10, %v5104_v51  ;;  %v4598_v51 = vrot.slane %v4585_v47, %v7569_v42 }
 0x2ee   : > { %5437 = vmatmul.mubr.msk.f32.vlgmr.msra.gmra.mrb[4].mxu1 %vm2435_vm10, %v5105_v61 }
 0x2ef   : > { %5439 = vmatprep.mubr.msk.f32.mxu1 %vm2435_vm10, %v5106_v20 }
 0x2f2   : > { %5440 = vmatmul.mubr.msk.f32.gmra.mrb[6].mxu1 %vm2435_vm10, %v5107_v40 }
 0x3a0   : > { %v3182_v35 = vpop.f32.mrb[8].mxu0 }
 0x3a1   : > { %v3184_v14 = vpop.f32.mrb[9].mxu0 }
 0x3a4   : > { %v3188_v7 = vpop.f32.mrb[10].mxu0 }
 0x3a5   : > { %v3190_v53 = vpop.f32.mrb[11].mxu0 }
 0x3a8   : > { %v3194_v4 = vpop.f32.mrb[12].mxu0 }
 0x3a9   : > { %v3196_v38 = vpop.f32.mrb[13].mxu0 }
 0x3ac   : > { %v3200_v25 = vpop.f32.mrb[14].mxu0 }
 0x3ad   : > { %v3202_v48 = vpop.f32.mrb[15].mxu0 }
 0x3b1   : > { %v4417_v27 = vpop.f32.mrb[8].mxu1 }
 0x3b2   : > { %v5611_v23 = vadd.f32 %v4417_v27, %v3182_v35  ;;  %v4419_v57 = vpop.f32.mrb[9].mxu1 }
 0x3b3   : > { %v5612_v10 = vadd.f32 %v4419_v57, %v3184_v14 }
 0x3b4   : > { %v4561_v46 = vadd.f32 %v5611_v23, %v4544_v50 }
 0x3b5   : > { %v4562_v58 = vadd.f32 %v5612_v10, %v4544_v50  ;;  %v4423_v26 = vpop.f32.mrb[10].mxu1 }
 0x3b6   : > { %v5613_v36 = vadd.f32 %v4423_v26, %v3188_v7  ;;  %v4425_v3 = vpop.f32.mrb[11].mxu1  ;;  %v4573_v16 = vmax.f32 %v4561_v46, 0.0 }
 0x3b7   : > { %v5614_v54 = vadd.f32 %v4425_v3, %v3190_v53  ;;  %v4574_v21 = vmax.f32 %v4562_v58, 0.0 }
 0x3b8   : > { %v4564_v63 = vadd.f32 %v5613_v36, %v4549_v12  ;;  %v4602_v62 = vmul.f32 %v4590_v32, %v4573_v16  ;;  %v4619_v16 = vpop.permute.xlu1 %4618 }
 0x3b9   : > { %v4565_v1 = vadd.f32 %v5614_v54, %v4549_v12  ;;  %v4429_v55 = vpop.f32.mrb[12].mxu1  ;;  %v4603_v17 = vmul.f32 %v4594_v33, %v4574_v21 }
 0x3ba   : > { %v4576_v0 = vmax.f32 %v4564_v63, 0.0  ;;  %v5615_v9 = vadd.f32 %v4429_v55, %v3194_v4  ;;  %v4431_v5 = vpop.f32.mrb[13].mxu1  ;;  %v6177_v63 = vmov 1966171168  }
 0x3bb   : > { %v4577_v37 = vmax.f32 %v4565_v1, 0.0  ;;  %v5616_v13 = vadd.f32 %v4431_v5, %v3196_v38  ;;  %v4774_v21 = vunpack.c.l.s4 %v6177_v63 }
 0x3bc   : > { %v4605_v39 = vmul.f32 %v4590_v32, %v4576_v0  ;;  %v4567_v29 = vadd.f32 %v5615_v9, %v4554_v31 }
 0x3bd   : > { %v4606_v22 = vmul.f32 %v4594_v33, %v4577_v37  ;;  %v4568_v11 = vadd.f32 %v5616_v13, %v4554_v31  ;;  %v4435_v59 = vpop.f32.mrb[14].mxu1  ;;  %v4775_v0 = vunpack.c.0.s8 %v4774_v21 }
 0x3be   : > { %v5599_v19 = vpack.c.bf16 %v4605_v39, %v4602_v62  ;;  %v5617_v45 = vadd.f32 %v4435_v59, %v3200_v25  ;;  %v4437_v2 = vpop.f32.mrb[15].mxu1  ;;  %v4579_v52 = vmax.f32 %v4567_v29, 0.0  ;;  %v7570_v39 = vlaneseq }
 0x3bf   : > { %v5618_v8 = vadd.f32 %v4437_v2, %v3202_v48  ;;  %v5597_v18 = vpack.c.bf16 %v4606_v22, %v4603_v17  ;;  %v4580_v56 = vmax.f32 %v4568_v11, 0.0 }
 0x3c0   : > { %v4570_v44 = vadd.f32 %v5617_v45, %v4559_v15  ;;  %v4608_v40 = vmul.f32 %v4590_v32, %v4579_v52  ;;  %vm4798_vm12 = vcmp.lt.s32.totalorder %v7570_v39, 320 }
 0x3c1   : > { %v4571_v49 = vadd.f32 %v5618_v8, %v4559_v15  ;;  %v5438_v34 = vpop.f32.mrb[4].mxu1  ;;  %5598 = vmatprep.subr.bf16.mxu0 %v5597_v18  ;;  %v4609_v7 = vmul.f32 %v4594_v33, %v4580_v56 }
 0x3c2   : > { %v4582_v43 = vmax.f32 %v4570_v44, 0.0  ;;  %v4566_v24 = vadd.f32 %v5438_v34, %v4549_v12  ;;  %v4506_v30 = vpop.f32.mrb[5].mxu1  ;;  %5600 = vmatpush1.bf16.msra.mxu0 %v5599_v19  ;;  %v6175_v12 = vmov 0.0|0.0  }
 0x3c3   : > { %v4583_v61 = vmax.f32 %v4571_v49, 0.0  ;;  %v4563_v20 = vadd.f32 %v4544_v50, %v4506_v30  ;;  %v4614_v50 = vld [vmem:[%s7525_s7] sm:$0x1] }
 0x3c4   : > { %v4611_v35 = vmul.f32 %v4590_v32, %v4582_v43  ;;  %v4578_v14 = vmax.f32 %v4566_v24, 0.0  ;;  %v4624_v32 = vrot.slane %v4619_v16, %v6752_v6 }
 0x3c5   : > { %v4612_v53 = vmul.f32 %v4594_v33, %v4583_v61  ;;  %v4575_v4 = vmax.f32 %v4563_v20, 0.0  ;;  %v5441_v38 = vpop.f32.mrb[6].mxu1 }
 0x3c6   : > { %v5603_v25 = vpack.c.bf16 %v4611_v35, %v4608_v40  ;;  %v4607_v48 = vmul.f32 %v4598_v51, %v4578_v14  ;;  %v4572_v27 = vadd.f32 %v5441_v38, %v4559_v15  ;;  %v4516_v23 = vpop.f32.mrb[7].mxu1 }
 0x3c7   : > { %v4604_v57 = vmul.f32 %v4598_v51, %v4575_v4  ;;  %v4569_v10 = vadd.f32 %v4554_v31, %v4516_v23  ;;  %v5601_v46 = vpack.c.bf16 %v4612_v53, %v4609_v7 }
 0x3c8   : > { %v4584_v58 = vmax.f32 %v4572_v27, 0.0 }
 0x3c9   : > { %v5606_v47 = vpack.c.bf16 %v4607_v48, %v4604_v57  ;;  %v4581_v26 = vmax.f32 %v4569_v10, 0.0  ;;  %5602 = vmatprep.subr.bf16.mxu0 %v5601_v46 }
 0x3ca   : > { %v4613_v36 = vmul.f32 %v4598_v51, %v4584_v58  ;;  %5604 = vmatpush1.bf16.msra.mxu0 %v5603_v25 }
 0x3cb   : > { %v4610_v3 = vmul.f32 %v4598_v51, %v4581_v26  ;;  %5605 = vmatprep.subr.bf16.mxu0 %v6175_v12 }
 0x3cd   : > { %v5609_v54 = vpack.c.bf16 %v4613_v36, %v4610_v3  ;;  %5116 = vmatmul.mubr.msk.f32.vlgmr.msra.gmra.mrb[16].mxu0 %vm2435_vm10, %v4614_v50 }
 0x3ce   : > { %5607 = vmatpush3.bf16.msra.mxu0 %v5606_v47  ;;  %5450 = vmatprep.mubr.msk.f32.mxu0 %vm6176_vm11, %v7555_v60  ;;  %v4778_v60 = vsub.s32 %v4775_v0, %v6717_v41 }
 0x3cf   : > { %5608 = vmatprep.subr.bf16.mxu0 %v6175_v12 }
 0x3d2   : > { %5610 = vmatpush3.bf16.msra.mxu0 %v5609_v54 }
 0x3d5   : > { %5451 = vmatmul.mubr.msk.f32.vlgmr.msra.gmra.mrb[18].mxu0 %vm2435_vm10, %v4614_v50 }
 0x4a0   : > { %v4694_v28 = vpop.f32.mrb[16].mxu0 }
 0x4a1   : > { %v4695_v33 = vadd.f32 %v4694_v28, %v4624_v32  ;;  %v4696_v1 = vpop.f32.mrb[17].mxu0 }
 0x4a2   : > { %v4697_v55 = vadd.f32 %v4696_v1, %v4624_v32 }
 0x4a4   : > { %v4772_v9 = vcombine.low %v4695_v33, %v4697_v55 }
 0x4a6   : > { %v4779_v13 = vrot.slane %v4772_v9, %v4778_v60 }
 0x4a8   : > { %v4765_v5 = vpop.f32.mrb[18].mxu0 }
 0x4a9   : > { %v4766_v31 = vadd.f32 %v4765_v5, %v4624_v32  ;;  %v5452_v37 = vpop.f32.mrb[19].mxu0 }
 0x4ab   : > { %v4786_v62 = vrot.slane %v4766_v31, %v4778_v60 }
 0x4ad   : > { %v4787_v6 = vcombine.low %v4779_v13, %v4786_v62 }
 0x4af   : > { %v4794_v29 = vrot.slane %v4787_v6, %v4778_v60 }
 0x4b1   : > { %4800 = vst.msk [vmem:[%s327_s26] sm:$0x7] %vm4798_vm12, %v4794_v29 }
 0x4b2   : > { %6114 = shalt.err (!%p6111_p3)
}
 0x4b3   : > { %s6115_s28 = scalar_lea.hbm %s7476_s29, 48  ;;  %s6119_s23 = scalar_lea.hbm %s7527_s9, 96 }
 0x4b4   : > { %p6116_p4 = scmp.ne.s32.totalorder %s7476_s29, %s6115_s28  ;;  %p6120_p9 = scmp.lt.u32.totalorder %s7476_s29, %s7527_s9 }
 0x4b5   : > { %p6121_p10 = scmp.lt.u32.totalorder %s6119_s23, %s6115_s28  ;;  %p6123_p12 = scmp.lt.u32.totalorder %s6115_s28, %s7476_s29 }
 0x4b6   : > { %p6117_p7 = pnand %p6116_p4, %p6270_p5 }
 0x4b7   : > { %p6122_p11 = por %p6121_p10, %p6120_p9 }
 0x4b8   : > { %p6118_p8 = pneg %p6117_p7 }
 0x4b9   : > { %p6124_p13 = por %p6123_p12, %p6122_p11 }
 0x4bb   : > { %p6125_p0 = pnand %p6124_p13, %p6118_p8 }
 0x4bd   : > { %6128 = shalt.err (!%p6125_p0)
}
 0x4be   : > { %5805 = dma.vmem_to_hbm [thread:$0]  (%p6270_p5), %s7478_s15, 48, %s7476_s29, %s4802_s17  }
 0x4bf PF: > { %p5811_p1 = scmp.ge.s32.totalorder %s6163_s14, 2  ;;  %s4828_s18 = sand.u32 1, %s6151_s11  }
 0x4c0   : > { %s4829_s30 = scalar_lea.sflag [#allocation4], %s4828_s18 }
 0x4c1   : > { %p5808_p2 = pnand %p5811_p1, %p6274_p6 }
 0x4c3   : > { %6146 = dma.done.wait (!%p5808_p2), %s4829_s30, 48  }
 0x4c4   : > { %6148 = vsyncadd (!%p5808_p2), %s4829_s30, 4294967248  ;;  %p21_p3 = scmp.ge.s32.totalorder %s6257_s16, 4   ;;  %s7571_s11 = smov %s6155_s12 }
 0x4c5   : > { %s7572_s12 = smov %s6159_s13  ;;  %s7573_s13 = smov %s6268_s19 }
 0x4c6   : > { %s7574_s14 = smov %s6257_s16  ;;  %23 = sbr.rel (!%p21_p3) target bundleno = 6 (0x6), region = 107 }
 0x4cd   :  { %4834 = vsyncpa [#allocation4], 1 }
 0x4ce   :  { %4836 = vsyncpa [#allocation4 + $0x1], 1 }

</bundles_post_ra>
